<compile_context>
chip_gen: v7x
topology: tpu7x:2x2x1
jax: 0.10.0
libtpu: 0.0.40
codegen_flags: <defaults>
</compile_context>

<pallas_src>
import math

import jax
import jax.numpy as jnp
from jax.experimental import pallas as pl
from jax.experimental.pallas import tpu as pltpu

# PointEnv_MultiStep_Two_goal: 2-D point robot -> state_dim = 2, action_dim = 2
STATE_DIM = 2
ACTION_DIM = 2
HIDDEN = 256
LANE = 128
MAX_BATCH_TILE = 4096


def _round_up(x, m):
    return ((x + m - 1) // m) * m


def _num_tensorcores():
    """2 on v7x (megacore-style grid sharding), 1 on v5e/v6e."""
    try:
        kind = jax.devices()[0].device_kind.lower()
    except Exception:
        return 1
    if "v7" in kind or "7x" in kind:
        return 2
    return 1


def _default_out_dtype():
    """bf16 writeback only on v6e, where the padded f32 output DMA sits at the
    HBM roofline; keep f32 elsewhere (v5e/v7x are compute-bound anyway)."""
    try:
        kind = jax.devices()[0].device_kind.lower()
    except Exception:
        return jnp.float32
    return jnp.bfloat16 if "v6" in kind else jnp.float32


def _default_batch_tile(B, num_cores):
    if num_cores > 1 and B >= 512:
        # v7x: shard the batch over the two TensorCores, each core >= 256 rows.
        return min(MAX_BATCH_TILE, _round_up(pl.cdiv(B, num_cores), 8))
    # Single-TC chips (v5e/v6e) or small batches: one grid step if possible —
    # extra grid steps are pure serial per-step overhead (~0.35us each).
    return min(MAX_BATCH_TILE, _round_up(B, 8))


def _retrieval_kernel(s_ref, a_ref,
                      w1s_ref, w1a_ref, b1_ref,
                      w2_ref, b2_ref,
                      w3_ref, b3_ref,
                      w4_ref, b4_ref,
                      out_ref):
    """Fused 4-layer MLP forward for one batch tile (everything in VMEM).

    Layer 1: f32 broadcast-FMAs on the VPU (K=2+2 is degenerate for the MXU).
    Layers 2-4: bf16 weights / bf16 matmul inputs, f32 MXU accumulation.
    Bias add / ReLU stay in f32.
    """
    s = s_ref[...]  # (tile, state_dim), f32
    a = a_ref[...]  # (tile, action_dim), f32

    # ---- Layer 1 on the VPU, fusing the concat:
    #   concat([s, a]) @ w1 + b1 == sum_j s[:,j]*w1s[j,:] + sum_j a[:,j]*w1a[j,:] + b1
    h = b1_ref[...]  # (1, hidden), broadcasts along sublanes
    for j in range(s_ref.shape[1]):
        h = h + s[:, j:j + 1] * w1s_ref[j:j + 1, :]
    for j in range(a_ref.shape[1]):
        h = h + a[:, j:j + 1] * w1a_ref[j:j + 1, :]
    h = jnp.maximum(h, 0.0)

    # ---- Layers 2-4 on the MXU (bf16 inputs, f32 accumulation).
    h = jnp.dot(h.astype(jnp.bfloat16), w2_ref[...],
                preferred_element_type=jnp.float32) + b2_ref[...]
    h = jnp.maximum(h, 0.0)

    h = jnp.dot(h.astype(jnp.bfloat16), w3_ref[...],
                preferred_element_type=jnp.float32) + b3_ref[...]
    h = jnp.maximum(h, 0.0)

    out = jnp.dot(h.astype(jnp.bfloat16), w4_ref[...],
                  preferred_element_type=jnp.float32) + b4_ref[...]
    out_ref[...] = out.astype(out_ref.dtype)  # full 128-lane-dense block


def retrieval_forward(state, action, params, *, batch_tile=None, out_dtype=None):
    """Runs the Retrieval MLP via a single fused Pallas kernel, tiled over batch.

    Always returns f32 of shape (B, out_dim)."""
    B, state_dim = state.shape
    action_dim = action.shape[1]
    hidden = params["w2"].shape[0]
    out_dim = params["w4"].shape[1]
    out_pad = _round_up(max(out_dim, LANE), LANE)  # lane-dense output width (128)

    if out_dtype is None:
        out_dtype = _default_out_dtype()

    # ---- prepare weights: split w1 (concat fusion, f32 for the VPU layer),
    #      pad layer 4 to 128 output lanes, cast layer 2-4 weights to bf16.
    w1 = params["w1"]
    w1s = w1[:state_dim, :].astype(jnp.float32)
    w1a = w1[state_dim:, :].astype(jnp.float32)
    b1 = params["b1"].astype(jnp.float32)
    w2 = params["w2"].astype(jnp.bfloat16)
    b2 = params["b2"].astype(jnp.float32)
    w3 = params["w3"].astype(jnp.bfloat16)
    b3 = params["b3"].astype(jnp.float32)
    w4 = jnp.pad(params["w4"], ((0, 0), (0, out_pad - out_dim))).astype(jnp.bfloat16)
    b4 = jnp.pad(params["b4"], ((0, 0), (0, out_pad - out_dim))).astype(jnp.float32)

    # ---- batch tiling.
    num_cores = _num_tensorcores()
    if batch_tile is None:
        batch_tile = _default_batch_tile(B, num_cores)
    batch_tile = max(8, _round_up(batch_tile, 8))
    B_pad = _round_up(B, batch_tile)
    if B_pad != B:
        state = jnp.pad(state, ((0, B_pad - B), (0, 0)))
        action = jnp.pad(action, ((0, B_pad - B), (0, 0)))
    grid = (B_pad // batch_tile,)

    weight_args = (w1s, w1a, b1, w2, b2, w3, b3, w4, b4)

    def row_spec(dim):
        return pl.BlockSpec((batch_tile, dim), lambda i: (i, 0))

    # Advisory cost estimate so XLA schedules the surrounding graph sensibly.
    flops = 2 * B_pad * ((state_dim + action_dim) * hidden    # layer 1 (VPU)
                         + 2 * hidden * hidden                # layers 2-3
                         + hidden * out_pad)                  # layer 4
    bytes_accessed = (
        (w1s.size + w1a.size) * 4                             # f32 layer-1 weights
        + (w2.size + w3.size + w4.size) * 2                   # bf16 weights
        + (b1.size + b2.size + b3.size + b4.size) * 4         # f32 biases
        + B_pad * (state_dim + action_dim) * 4                # f32 inputs
        + B_pad * out_pad * jnp.dtype(out_dtype).itemsize)    # padded output
    cost = pl.CostEstimate(flops=flops, transcendentals=0,
                           bytes_accessed=bytes_accessed)

    def build(weight_pipeline_mode):
        def full_spec(arr):
            # Weight / bias: same full block every grid step (stays resident).
            kwargs = ({} if weight_pipeline_mode is None
                      else {"pipeline_mode": weight_pipeline_mode})
            return pl.BlockSpec(arr.shape,
                                lambda i, _nd=arr.ndim: (0,) * _nd,
                                **kwargs)

        in_specs = ([row_spec(state_dim), row_spec(action_dim)]
                    + [full_spec(a) for a in weight_args])
        return pl.pallas_call(
            _retrieval_kernel,
            out_shape=jax.ShapeDtypeStruct((B_pad, out_pad), out_dtype),
            grid_spec=pltpu.PrefetchScalarGridSpec(
                num_scalar_prefetch=0,
                grid=grid,
                in_specs=in_specs,
                out_specs=pl.BlockSpec((batch_tile, out_pad), lambda i: (i, 0)),
            ),
            compiler_params=pltpu.CompilerParams(
                dimension_semantics=("parallel",),
                vmem_limit_bytes=32 * 1024 * 1024),
            cost_estimate=cost,
        )

    try:
        # Single-buffer the resident weights (constant index_map, never change
        # across grid steps) — saves VMEM / a redundant second-buffer DMA.
        out_padded = build(pl.Buffered(1))(state, action, *weight_args)
    except Exception:
        # Fallback: default double-buffering (correct, slightly more VMEM).
        out_padded = build(None)(state, action, *weight_args)

    return out_padded[:B, :out_dim].astype(jnp.float32)


def init_params(key, state_dim=STATE_DIM, action_dim=ACTION_DIM, hidden=HIDDEN):
    """Deterministic init matching nn.Linear's U(-1/sqrt(fan_in), 1/sqrt(fan_in)).

    Weights are stored as [in, out] (transpose of PyTorch's [out, in]) so the
    kernel does x @ W. Biases are kept 2-D ([1, out]) for TPU-friendly layout.
    """
    dims = [(state_dim + action_dim, hidden),
            (hidden, hidden),
            (hidden, hidden),
            (hidden, state_dim)]
    params = {}
    for idx, (fan_in, fan_out) in enumerate(dims, start=1):
        key, kw, kb = jax.random.split(key, 3)
        bound = 1.0 / math.sqrt(fan_in)
        params[f"w{idx}"] = jax.random.uniform(
            kw, (fan_in, fan_out), jnp.float32, minval=-bound, maxval=bound)
        params[f"b{idx}"] = jax.random.uniform(
            kb, (1, fan_out), jnp.float32, minval=-bound, maxval=bound)
    return params


def retrieval_reference_mixed(state, action, params):
    """Pure-JAX reference mirroring the kernel's precision path:
    layer 1 in f32, layers 2-4 with bf16 weights/inputs and f32 accumulation."""
    sd = state.shape[1]
    w1s = params["w1"][:sd, :]
    w1a = params["w1"][sd:, :]
    w2 = params["w2"].astype(jnp.bfloat16)
    w3 = params["w3"].astype(jnp.bfloat16)
    w4 = params["w4"].astype(jnp.bfloat16)

    h = state @ w1s + action @ w1a + params["b1"]
    h = jnp.maximum(h, 0.0)
    h = jnp.dot(h.astype(jnp.bfloat16), w2, preferred_element_type=jnp.float32) + params["b2"]
    h = jnp.maximum(h, 0.0)
    h = jnp.dot(h.astype(jnp.bfloat16), w3, preferred_element_type=jnp.float32) + params["b3"]
    h = jnp.maximum(h, 0.0)
    return jnp.dot(h.astype(jnp.bfloat16), w4, preferred_element_type=jnp.float32) + params["b4"]


def retrieval_reference_f32(state, action, params):
    """Full-f32 reference matching the original PyTorch module semantics."""
    h = jnp.concatenate([state, action], axis=-1)
    h = jax.nn.relu(h @ params["w1"] + params["b1"])
    h = jax.nn.relu(h @ params["w2"] + params["b2"])
    h = jax.nn.relu(h @ params["w3"] + params["b3"])
    return h @ params["w4"] + params["b4"]


if __name__ == "__main__":
    key = jax.random.PRNGKey(0)
    kp, ks, ka = jax.random.split(key, 3)

    params = init_params(kp)

    batch = 8
    state = jax.random.normal(ks, (batch, STATE_DIM), jnp.float32)
    action = jax.random.normal(ka, (batch, ACTION_DIM), jnp.float32)

    out = retrieval_forward(state, action, params)
    out = jax.block_until_ready(out)
    assert out.shape == (batch, STATE_DIM), out.shape

    # Tolerance accounts for the optional bf16 writeback (v6e only).
    bf16_writeback = _default_out_dtype() == jnp.bfloat16
    tol = 2e-2 if bf16_writeback else 1e-3

    # Primary check: reference with the same mixed-precision path as the kernel.
    ref_mixed = retrieval_reference_mixed(state, action, params)
    assert jnp.allclose(out, ref_mixed, atol=tol, rtol=tol), "mismatch vs mixed-precision reference"

    # Sanity check vs the original full-f32 semantics (loose: bf16 weight rounding in layers 2-4).
    ref_f32 = retrieval_reference_f32(state, action, params)
    assert jnp.allclose(out, ref_f32, atol=5e-2, rtol=5e-2), "mismatch vs f32 reference"

    print("KERNEL_OK")
</pallas_src>

<mosaic_0001>
module attributes {stable_mosaic.version = 11 : i64} {
  func.func @_retrieval_kernel(%arg0: i32, %arg1: memref<8x2xf32, #tpu.memory_space<vmem>>, %arg2: memref<8x2xf32, #tpu.memory_space<vmem>>, %arg3: memref<2x256xf32, #tpu.memory_space<vmem>>, %arg4: memref<2x256xf32, #tpu.memory_space<vmem>>, %arg5: memref<1x256xf32, #tpu.memory_space<vmem>>, %arg6: memref<256x256xbf16, #tpu.memory_space<vmem>>, %arg7: memref<1x256xf32, #tpu.memory_space<vmem>>, %arg8: memref<256x256xbf16, #tpu.memory_space<vmem>>, %arg9: memref<1x256xf32, #tpu.memory_space<vmem>>, %arg10: memref<256x128xbf16, #tpu.memory_space<vmem>>, %arg11: memref<1x128xf32, #tpu.memory_space<vmem>>, %arg12: memref<8x128xf32, #tpu.memory_space<vmem>>) attributes {dimension_semantics = [#tpu.dimension_semantics<parallel>], iteration_bounds = array<i64: 1>, scalar_prefetch = 0 : i64, scratch_operands = 0 : i64, tpu.core_type = #tpu.core_type<tc>, window_params = [{transform_indices = @transform_0, window_bounds = array<i64: 8, 2>}, {transform_indices = @transform_1, window_bounds = array<i64: 8, 2>}, {pipeline_mode = #tpu.pipeline_mode<synchronous>, transform_indices = @transform_2, window_bounds = array<i64: 2, 256>}, {pipeline_mode = #tpu.pipeline_mode<synchronous>, transform_indices = @transform_3, window_bounds = array<i64: 2, 256>}, {pipeline_mode = #tpu.pipeline_mode<synchronous>, transform_indices = @transform_4, window_bounds = array<i64: 1, 256>}, {pipeline_mode = #tpu.pipeline_mode<synchronous>, transform_indices = @transform_5, window_bounds = array<i64: 256, 256>}, {pipeline_mode = #tpu.pipeline_mode<synchronous>, transform_indices = @transform_6, window_bounds = array<i64: 1, 256>}, {pipeline_mode = #tpu.pipeline_mode<synchronous>, transform_indices = @transform_7, window_bounds = array<i64: 256, 256>}, {pipeline_mode = #tpu.pipeline_mode<synchronous>, transform_indices = @transform_8, window_bounds = array<i64: 1, 256>}, {pipeline_mode = #tpu.pipeline_mode<synchronous>, transform_indices = @transform_9, window_bounds = array<i64: 256, 128>}, {pipeline_mode = #tpu.pipeline_mode<synchronous>, transform_indices = @transform_10, window_bounds = array<i64: 1, 128>}, {transform_indices = @transform_11, window_bounds = array<i64: 8, 128>}]} {
    %c0 = arith.constant 0 : index
    %c0_0 = arith.constant 0 : index
    %0 = vector.load %arg1[%c0, %c0_0] : memref<8x2xf32, #tpu.memory_space<vmem>>, vector<8x2xf32>
    %c0_1 = arith.constant 0 : index
    %c0_2 = arith.constant 0 : index
    %1 = vector.load %arg2[%c0_1, %c0_2] : memref<8x2xf32, #tpu.memory_space<vmem>>, vector<8x2xf32>
    %c0_3 = arith.constant 0 : index
    %c0_4 = arith.constant 0 : index
    %2 = vector.load %arg5[%c0_3, %c0_4] : memref<1x256xf32, #tpu.memory_space<vmem>>, vector<1x256xf32>
    %3 = vector.extract_strided_slice %0 {offsets = [0, 0], sizes = [8, 1], strides = [1, 1]} : vector<8x2xf32> to vector<8x1xf32>
    %c0_5 = arith.constant 0 : index
    %c0_6 = arith.constant 0 : index
    %4 = vector.load %arg3[%c0_5, %c0_6] : memref<2x256xf32, #tpu.memory_space<vmem>>, vector<1x256xf32>
    %5 = vector.broadcast %3 : vector<8x1xf32> to vector<8x256xf32>
    %6 = vector.broadcast %4 : vector<1x256xf32> to vector<8x256xf32>
    %7 = arith.mulf %5, %6 : vector<8x256xf32>
    %8 = vector.broadcast %2 : vector<1x256xf32> to vector<8x256xf32>
    %9 = arith.addf %8, %7 : vector<8x256xf32>
    %10 = vector.extract_strided_slice %0 {offsets = [0, 1], sizes = [8, 1], strides = [1, 1]} : vector<8x2xf32> to vector<8x1xf32>
    %c1 = arith.constant 1 : index
    %c0_7 = arith.constant 0 : index
    %11 = vector.load %arg3[%c1, %c0_7] : memref<2x256xf32, #tpu.memory_space<vmem>>, vector<1x256xf32>
    %12 = vector.broadcast %10 : vector<8x1xf32> to vector<8x256xf32>
    %13 = vector.broadcast %11 : vector<1x256xf32> to vector<8x256xf32>
    %14 = arith.mulf %12, %13 : vector<8x256xf32>
    %15 = arith.addf %9, %14 : vector<8x256xf32>
    %16 = vector.extract_strided_slice %1 {offsets = [0, 0], sizes = [8, 1], strides = [1, 1]} : vector<8x2xf32> to vector<8x1xf32>
    %c0_8 = arith.constant 0 : index
    %c0_9 = arith.constant 0 : index
    %17 = vector.load %arg4[%c0_8, %c0_9] : memref<2x256xf32, #tpu.memory_space<vmem>>, vector<1x256xf32>
    %18 = vector.broadcast %16 : vector<8x1xf32> to vector<8x256xf32>
    %19 = vector.broadcast %17 : vector<1x256xf32> to vector<8x256xf32>
    %20 = arith.mulf %18, %19 : vector<8x256xf32>
    %21 = arith.addf %15, %20 : vector<8x256xf32>
    %22 = vector.extract_strided_slice %1 {offsets = [0, 1], sizes = [8, 1], strides = [1, 1]} : vector<8x2xf32> to vector<8x1xf32>
    %c1_10 = arith.constant 1 : index
    %c0_11 = arith.constant 0 : index
    %23 = vector.load %arg4[%c1_10, %c0_11] : memref<2x256xf32, #tpu.memory_space<vmem>>, vector<1x256xf32>
    %24 = vector.broadcast %22 : vector<8x1xf32> to vector<8x256xf32>
    %25 = vector.broadcast %23 : vector<1x256xf32> to vector<8x256xf32>
    %26 = arith.mulf %24, %25 : vector<8x256xf32>
    %27 = arith.addf %21, %26 : vector<8x256xf32>
    %cst = arith.constant 0.000000e+00 : f32
    %28 = vector.broadcast %cst : f32 to vector<8x256xf32>
    %29 = arith.maximumf %27, %28 : vector<8x256xf32>
    %30 = arith.truncf %29 : vector<8x256xf32> to vector<8x256xbf16>
    %c0_12 = arith.constant 0 : index
    %c0_13 = arith.constant 0 : index
    %31 = vector.load %arg6[%c0_12, %c0_13] : memref<256x256xbf16, #tpu.memory_space<vmem>>, vector<256x256xbf16>
    %cst_14 = arith.constant dense<0.000000e+00> : vector<8x256xf32>
    %32 = tpu.matmul %30, %31, %cst_14 {dimension_numbers = #tpu.dot_dimension_numbers<[1], [0], [0], [1], [0, 0, 1, 1], [], []>} : vector<8x256xbf16>, vector<256x256xbf16>, vector<8x256xf32> -> vector<8x256xf32>
    %c0_15 = arith.constant 0 : index
    %c0_16 = arith.constant 0 : index
    %33 = vector.load %arg7[%c0_15, %c0_16] : memref<1x256xf32, #tpu.memory_space<vmem>>, vector<1x256xf32>
    %34 = vector.broadcast %33 : vector<1x256xf32> to vector<8x256xf32>
    %35 = arith.addf %32, %34 : vector<8x256xf32>
    %cst_17 = arith.constant 0.000000e+00 : f32
    %36 = vector.broadcast %cst_17 : f32 to vector<8x256xf32>
    %37 = arith.maximumf %35, %36 : vector<8x256xf32>
    %38 = arith.truncf %37 : vector<8x256xf32> to vector<8x256xbf16>
    %c0_18 = arith.constant 0 : index
    %c0_19 = arith.constant 0 : index
    %39 = vector.load %arg8[%c0_18, %c0_19] : memref<256x256xbf16, #tpu.memory_space<vmem>>, vector<256x256xbf16>
    %cst_20 = arith.constant dense<0.000000e+00> : vector<8x256xf32>
    %40 = tpu.matmul %38, %39, %cst_20 {dimension_numbers = #tpu.dot_dimension_numbers<[1], [0], [0], [1], [0, 0, 1, 1], [], []>} : vector<8x256xbf16>, vector<256x256xbf16>, vector<8x256xf32> -> vector<8x256xf32>
    %c0_21 = arith.constant 0 : index
    %c0_22 = arith.constant 0 : index
    %41 = vector.load %arg9[%c0_21, %c0_22] : memref<1x256xf32, #tpu.memory_space<vmem>>, vector<1x256xf32>
    %42 = vector.broadcast %41 : vector<1x256xf32> to vector<8x256xf32>
    %43 = arith.addf %40, %42 : vector<8x256xf32>
    %cst_23 = arith.constant 0.000000e+00 : f32
    %44 = vector.broadcast %cst_23 : f32 to vector<8x256xf32>
    %45 = arith.maximumf %43, %44 : vector<8x256xf32>
    %46 = arith.truncf %45 : vector<8x256xf32> to vector<8x256xbf16>
    %c0_24 = arith.constant 0 : index
    %c0_25 = arith.constant 0 : index
    %47 = vector.load %arg10[%c0_24, %c0_25] : memref<256x128xbf16, #tpu.memory_space<vmem>>, vector<256x128xbf16>
    %cst_26 = arith.constant dense<0.000000e+00> : vector<8x128xf32>
    %48 = tpu.matmul %46, %47, %cst_26 {dimension_numbers = #tpu.dot_dimension_numbers<[1], [0], [0], [1], [0, 0, 1, 1], [], []>} : vector<8x256xbf16>, vector<256x128xbf16>, vector<8x128xf32> -> vector<8x128xf32>
    %c0_27 = arith.constant 0 : index
    %c0_28 = arith.constant 0 : index
    %49 = vector.load %arg11[%c0_27, %c0_28] : memref<1x128xf32, #tpu.memory_space<vmem>>, vector<1x128xf32>
    %50 = vector.broadcast %49 : vector<1x128xf32> to vector<8x128xf32>
    %51 = arith.addf %48, %50 : vector<8x128xf32>
    %c0_29 = arith.constant 0 : index
    %c0_30 = arith.constant 0 : index
    %52 = vector.load %arg12[%c0_29, %c0_30] : memref<8x128xf32, #tpu.memory_space<vmem>>, vector<8x128xf32>
    tpu.vector_store %arg12[%c0_29, %c0_30], %51 {strides = array<i32>} : memref<8x128xf32, #tpu.memory_space<vmem>>, vector<8x128xf32>,
    return
  }
  func.func @transform_0(%arg0: i32) -> (i32, i32) {
    %c0_i32 = arith.constant 0 : i32
    %c0_i32_0 = arith.constant 0 : i32
    return %arg0, %c0_i32 : i32, i32
  }
  func.func @transform_1(%arg0: i32) -> (i32, i32) {
    %c0_i32 = arith.constant 0 : i32
    %c0_i32_0 = arith.constant 0 : i32
    return %arg0, %c0_i32 : i32, i32
  }
  func.func @transform_2(%arg0: i32) -> (i32, i32) {
    %c0_i32 = arith.constant 0 : i32
    %c0_i32_0 = arith.constant 0 : i32
    %c0_i32_1 = arith.constant 0 : i32
    return %c0_i32, %c0_i32_0 : i32, i32
  }
  func.func @transform_3(%arg0: i32) -> (i32, i32) {
    %c0_i32 = arith.constant 0 : i32
    %c0_i32_0 = arith.constant 0 : i32
    %c0_i32_1 = arith.constant 0 : i32
    return %c0_i32, %c0_i32_0 : i32, i32
  }
  func.func @transform_4(%arg0: i32) -> (i32, i32) {
    %c0_i32 = arith.constant 0 : i32
    %c0_i32_0 = arith.constant 0 : i32
    %c0_i32_1 = arith.constant 0 : i32
    return %c0_i32, %c0_i32_0 : i32, i32
  }
  func.func @transform_5(%arg0: i32) -> (i32, i32) {
    %c0_i32 = arith.constant 0 : i32
    %c0_i32_0 = arith.constant 0 : i32
    %c0_i32_1 = arith.constant 0 : i32
    return %c0_i32, %c0_i32_0 : i32, i32
  }
  func.func @transform_6(%arg0: i32) -> (i32, i32) {
    %c0_i32 = arith.constant 0 : i32
    %c0_i32_0 = arith.constant 0 : i32
    %c0_i32_1 = arith.constant 0 : i32
    return %c0_i32, %c0_i32_0 : i32, i32
  }
  func.func @transform_7(%arg0: i32) -> (i32, i32) {
    %c0_i32 = arith.constant 0 : i32
    %c0_i32_0 = arith.constant 0 : i32
    %c0_i32_1 = arith.constant 0 : i32
    return %c0_i32, %c0_i32_0 : i32, i32
  }
  func.func @transform_8(%arg0: i32) -> (i32, i32) {
    %c0_i32 = arith.constant 0 : i32
    %c0_i32_0 = arith.constant 0 : i32
    %c0_i32_1 = arith.constant 0 : i32
    return %c0_i32, %c0_i32_0 : i32, i32
  }
  func.func @transform_9(%arg0: i32) -> (i32, i32) {
    %c0_i32 = arith.constant 0 : i32
    %c0_i32_0 = arith.constant 0 : i32
    %c0_i32_1 = arith.constant 0 : i32
    return %c0_i32, %c0_i32_0 : i32, i32
  }
  func.func @transform_10(%arg0: i32) -> (i32, i32) {
    %c0_i32 = arith.constant 0 : i32
    %c0_i32_0 = arith.constant 0 : i32
    %c0_i32_1 = arith.constant 0 : i32
    return %c0_i32, %c0_i32_0 : i32, i32
  }
  func.func @transform_11(%arg0: i32) -> (i32, i32) {
    %c0_i32 = arith.constant 0 : i32
    %c0_i32_0 = arith.constant 0 : i32
    return %arg0, %c0_i32 : i32, i32
  }
}

module attributes {stable_mosaic.version = 11 : i64} {
  func.func @_retrieval_kernel(%arg0: i32, %arg1: memref<8x2xf32, #tpu.memory_space<vmem>>, %arg2: memref<8x2xf32, #tpu.memory_space<vmem>>, %arg3: memref<2x256xf32, #tpu.memory_space<vmem>>, %arg4: memref<2x256xf32, #tpu.memory_space<vmem>>, %arg5: memref<1x256xf32, #tpu.memory_space<vmem>>, %arg6: memref<256x256xbf16, #tpu.memory_space<vmem>>, %arg7: memref<1x256xf32, #tpu.memory_space<vmem>>, %arg8: memref<256x256xbf16, #tpu.memory_space<vmem>>, %arg9: memref<1x256xf32, #tpu.memory_space<vmem>>, %arg10: memref<256x128xbf16, #tpu.memory_space<vmem>>, %arg11: memref<1x128xf32, #tpu.memory_space<vmem>>, %arg12: memref<8x128xf32, #tpu.memory_space<vmem>>) attributes {dimension_semantics = [#tpu.dimension_semantics<parallel>], iteration_bounds = array<i64: 1>, scalar_prefetch = 0 : i64, scratch_operands = 0 : i64, tpu.core_type = #tpu.core_type<tc>, window_params = [{transform_indices = @transform_0, window_bounds = array<i64: 8, 2>}, {transform_indices = @transform_1, window_bounds = array<i64: 8, 2>}, {pipeline_mode = #tpu.pipeline_mode<synchronous>, transform_indices = @transform_2, window_bounds = array<i64: 2, 256>}, {pipeline_mode = #tpu.pipeline_mode<synchronous>, transform_indices = @transform_3, window_bounds = array<i64: 2, 256>}, {pipeline_mode = #tpu.pipeline_mode<synchronous>, transform_indices = @transform_4, window_bounds = array<i64: 1, 256>}, {pipeline_mode = #tpu.pipeline_mode<synchronous>, transform_indices = @transform_5, window_bounds = array<i64: 256, 256>}, {pipeline_mode = #tpu.pipeline_mode<synchronous>, transform_indices = @transform_6, window_bounds = array<i64: 1, 256>}, {pipeline_mode = #tpu.pipeline_mode<synchronous>, transform_indices = @transform_7, window_bounds = array<i64: 256, 256>}, {pipeline_mode = #tpu.pipeline_mode<synchronous>, transform_indices = @transform_8, window_bounds = array<i64: 1, 256>}, {pipeline_mode = #tpu.pipeline_mode<synchronous>, transform_indices = @transform_9, window_bounds = array<i64: 256, 128>}, {pipeline_mode = #tpu.pipeline_mode<synchronous>, transform_indices = @transform_10, window_bounds = array<i64: 1, 128>}, {transform_indices = @transform_11, window_bounds = array<i64: 8, 128>}]} {
    %c0 = arith.constant 0 : index
    %c0_0 = arith.constant 0 : index
    %0 = vector.load %arg1[%c0, %c0_0] : memref<8x2xf32, #tpu.memory_space<vmem>>, vector<8x2xf32>
    %c0_1 = arith.constant 0 : index
    %c0_2 = arith.constant 0 : index
    %1 = vector.load %arg2[%c0_1, %c0_2] : memref<8x2xf32, #tpu.memory_space<vmem>>, vector<8x2xf32>
    %c0_3 = arith.constant 0 : index
    %c0_4 = arith.constant 0 : index
    %2 = vector.load %arg5[%c0_3, %c0_4] : memref<1x256xf32, #tpu.memory_space<vmem>>, vector<1x256xf32>
    %3 = vector.extract_strided_slice %0 {offsets = [0, 0], sizes = [8, 1], strides = [1, 1]} : vector<8x2xf32> to vector<8x1xf32>
    %c0_5 = arith.constant 0 : index
    %c0_6 = arith.constant 0 : index
    %4 = vector.load %arg3[%c0_5, %c0_6] : memref<2x256xf32, #tpu.memory_space<vmem>>, vector<1x256xf32>
    %5 = vector.broadcast %3 : vector<8x1xf32> to vector<8x256xf32>
    %6 = vector.broadcast %4 : vector<1x256xf32> to vector<8x256xf32>
    %7 = arith.mulf %5, %6 : vector<8x256xf32>
    %8 = vector.broadcast %2 : vector<1x256xf32> to vector<8x256xf32>
    %9 = arith.addf %8, %7 : vector<8x256xf32>
    %10 = vector.extract_strided_slice %0 {offsets = [0, 1], sizes = [8, 1], strides = [1, 1]} : vector<8x2xf32> to vector<8x1xf32>
    %c1 = arith.constant 1 : index
    %c0_7 = arith.constant 0 : index
    %11 = vector.load %arg3[%c1, %c0_7] : memref<2x256xf32, #tpu.memory_space<vmem>>, vector<1x256xf32>
    %12 = vector.broadcast %10 : vector<8x1xf32> to vector<8x256xf32>
    %13 = vector.broadcast %11 : vector<1x256xf32> to vector<8x256xf32>
    %14 = arith.mulf %12, %13 : vector<8x256xf32>
    %15 = arith.addf %9, %14 : vector<8x256xf32>
    %16 = vector.extract_strided_slice %1 {offsets = [0, 0], sizes = [8, 1], strides = [1, 1]} : vector<8x2xf32> to vector<8x1xf32>
    %c0_8 = arith.constant 0 : index
    %c0_9 = arith.constant 0 : index
    %17 = vector.load %arg4[%c0_8, %c0_9] : memref<2x256xf32, #tpu.memory_space<vmem>>, vector<1x256xf32>
    %18 = vector.broadcast %16 : vector<8x1xf32> to vector<8x256xf32>
    %19 = vector.broadcast %17 : vector<1x256xf32> to vector<8x256xf32>
    %20 = arith.mulf %18, %19 : vector<8x256xf32>
    %21 = arith.addf %15, %20 : vector<8x256xf32>
    %22 = vector.extract_strided_slice %1 {offsets = [0, 1], sizes = [8, 1], strides = [1, 1]} : vector<8x2xf32> to vector<8x1xf32>
    %c1_10 = arith.constant 1 : index
    %c0_11 = arith.constant 0 : index
    %23 = vector.load %arg4[%c1_10, %c0_11] : memref<2x256xf32, #tpu.memory_space<vmem>>, vector<1x256xf32>
    %24 = vector.broadcast %22 : vector<8x1xf32> to vector<8x256xf32>
    %25 = vector.broadcast %23 : vector<1x256xf32> to vector<8x256xf32>
    %26 = arith.mulf %24, %25 : vector<8x256xf32>
    %27 = arith.addf %21, %26 : vector<8x256xf32>
    %cst = arith.constant 0.000000e+00 : f32
    %28 = vector.broadcast %cst : f32 to vector<8x256xf32>
    %29 = arith.maximumf %27, %28 : vector<8x256xf32>
    %30 = arith.truncf %29 : vector<8x256xf32> to vector<8x256xbf16>
    %c0_12 = arith.constant 0 : index
    %c0_13 = arith.constant 0 : index
    %31 = vector.load %arg6[%c0_12, %c0_13] : memref<256x256xbf16, #tpu.memory_space<vmem>>, vector<256x256xbf16>
    %cst_14 = arith.constant dense<0.000000e+00> : vector<8x256xf32>
    %32 = tpu.matmul %30, %31, %cst_14 {dimension_numbers = #tpu.dot_dimension_numbers<[1], [0], [0], [1], [0, 0, 1, 1], [], []>} : vector<8x256xbf16>, vector<256x256xbf16>, vector<8x256xf32> -> vector<8x256xf32>
    %c0_15 = arith.constant 0 : index
    %c0_16 = arith.constant 0 : index
    %33 = vector.load %arg7[%c0_15, %c0_16] : memref<1x256xf32, #tpu.memory_space<vmem>>, vector<1x256xf32>
    %34 = vector.broadcast %33 : vector<1x256xf32> to vector<8x256xf32>
    %35 = arith.addf %32, %34 : vector<8x256xf32>
    %cst_17 = arith.constant 0.000000e+00 : f32
    %36 = vector.broadcast %cst_17 : f32 to vector<8x256xf32>
    %37 = arith.maximumf %35, %36 : vector<8x256xf32>
    %38 = arith.truncf %37 : vector<8x256xf32> to vector<8x256xbf16>
    %c0_18 = arith.constant 0 : index
    %c0_19 = arith.constant 0 : index
    %39 = vector.load %arg8[%c0_18, %c0_19] : memref<256x256xbf16, #tpu.memory_space<vmem>>, vector<256x256xbf16>
    %cst_20 = arith.constant dense<0.000000e+00> : vector<8x256xf32>
    %40 = tpu.matmul %38, %39, %cst_20 {dimension_numbers = #tpu.dot_dimension_numbers<[1], [0], [0], [1], [0, 0, 1, 1], [], []>} : vector<8x256xbf16>, vector<256x256xbf16>, vector<8x256xf32> -> vector<8x256xf32>
    %c0_21 = arith.constant 0 : index
    %c0_22 = arith.constant 0 : index
    %41 = vector.load %arg9[%c0_21, %c0_22] : memref<1x256xf32, #tpu.memory_space<vmem>>, vector<1x256xf32>
    %42 = vector.broadcast %41 : vector<1x256xf32> to vector<8x256xf32>
    %43 = arith.addf %40, %42 : vector<8x256xf32>
    %cst_23 = arith.constant 0.000000e+00 : f32
    %44 = vector.broadcast %cst_23 : f32 to vector<8x256xf32>
    %45 = arith.maximumf %43, %44 : vector<8x256xf32>
    %46 = arith.truncf %45 : vector<8x256xf32> to vector<8x256xbf16>
    %c0_24 = arith.constant 0 : index
    %c0_25 = arith.constant 0 : index
    %47 = vector.load %arg10[%c0_24, %c0_25] : memref<256x128xbf16, #tpu.memory_space<vmem>>, vector<256x128xbf16>
    %cst_26 = arith.constant dense<0.000000e+00> : vector<8x128xf32>
    %48 = tpu.matmul %46, %47, %cst_26 {dimension_numbers = #tpu.dot_dimension_numbers<[1], [0], [0], [1], [0, 0, 1, 1], [], []>} : vector<8x256xbf16>, vector<256x128xbf16>, vector<8x128xf32> -> vector<8x128xf32>
    %c0_27 = arith.constant 0 : index
    %c0_28 = arith.constant 0 : index
    %49 = vector.load %arg11[%c0_27, %c0_28] : memref<1x128xf32, #tpu.memory_space<vmem>>, vector<1x128xf32>
    %50 = vector.broadcast %49 : vector<1x128xf32> to vector<8x128xf32>
    %51 = arith.addf %48, %50 : vector<8x128xf32>
    %c0_29 = arith.constant 0 : index
    %c0_30 = arith.constant 0 : index
    %52 = vector.load %arg12[%c0_29, %c0_30] : memref<8x128xf32, #tpu.memory_space<vmem>>, vector<8x128xf32>
    tpu.vector_store %arg12[%c0_29, %c0_30], %51 {strides = array<i32>} : memref<8x128xf32, #tpu.memory_space<vmem>>, vector<8x128xf32>,
    return
  }
  func.func @transform_0(%arg0: i32) -> (i32, i32) {
    %c0_i32 = arith.constant 0 : i32
    %c0_i32_0 = arith.constant 0 : i32
    return %arg0, %c0_i32 : i32, i32
  }
  func.func @transform_1(%arg0: i32) -> (i32, i32) {
    %c0_i32 = arith.constant 0 : i32
    %c0_i32_0 = arith.constant 0 : i32
    return %arg0, %c0_i32 : i32, i32
  }
  func.func @transform_2(%arg0: i32) -> (i32, i32) {
    %c0_i32 = arith.constant 0 : i32
    %c0_i32_0 = arith.constant 0 : i32
    %c0_i32_1 = arith.constant 0 : i32
    return %c0_i32, %c0_i32_0 : i32, i32
  }
  func.func @transform_3(%arg0: i32) -> (i32, i32) {
    %c0_i32 = arith.constant 0 : i32
    %c0_i32_0 = arith.constant 0 : i32
    %c0_i32_1 = arith.constant 0 : i32
    return %c0_i32, %c0_i32_0 : i32, i32
  }
  func.func @transform_4(%arg0: i32) -> (i32, i32) {
    %c0_i32 = arith.constant 0 : i32
    %c0_i32_0 = arith.constant 0 : i32
    %c0_i32_1 = arith.constant 0 : i32
    return %c0_i32, %c0_i32_0 : i32, i32
  }
  func.func @transform_5(%arg0: i32) -> (i32, i32) {
    %c0_i32 = arith.constant 0 : i32
    %c0_i32_0 = arith.constant 0 : i32
    %c0_i32_1 = arith.constant 0 : i32
    return %c0_i32, %c0_i32_0 : i32, i32
  }
  func.func @transform_6(%arg0: i32) -> (i32, i32) {
    %c0_i32 = arith.constant 0 : i32
    %c0_i32_0 = arith.constant 0 : i32
    %c0_i32_1 = arith.constant 0 : i32
    return %c0_i32, %c0_i32_0 : i32, i32
  }
  func.func @transform_7(%arg0: i32) -> (i32, i32) {
    %c0_i32 = arith.constant 0 : i32
    %c0_i32_0 = arith.constant 0 : i32
    %c0_i32_1 = arith.constant 0 : i32
    return %c0_i32, %c0_i32_0 : i32, i32
  }
  func.func @transform_8(%arg0: i32) -> (i32, i32) {
    %c0_i32 = arith.constant 0 : i32
    %c0_i32_0 = arith.constant 0 : i32
    %c0_i32_1 = arith.constant 0 : i32
    return %c0_i32, %c0_i32_0 : i32, i32
  }
  func.func @transform_9(%arg0: i32) -> (i32, i32) {
    %c0_i32 = arith.constant 0 : i32
    %c0_i32_0 = arith.constant 0 : i32
    %c0_i32_1 = arith.constant 0 : i32
    return %c0_i32, %c0_i32_0 : i32, i32
  }
  func.func @transform_10(%arg0: i32) -> (i32, i32) {
    %c0_i32 = arith.constant 0 : i32
    %c0_i32_0 = arith.constant 0 : i32
    %c0_i32_1 = arith.constant 0 : i32
    return %c0_i32, %c0_i32_0 : i32, i32
  }
  func.func @transform_11(%arg0: i32) -> (i32, i32) {
    %c0_i32 = arith.constant 0 : i32
    %c0_i32_0 = arith.constant 0 : i32
    return %arg0, %c0_i32 : i32, i32
  }
}

</mosaic_0001>

<bundles_post_ra>
// kernel: tpu_custom_call.1
= control target key start
LH: loop header
LB: loop body
LE: loop exit
PB: predicated region body
PF: predicated region fallthrough
CT: control target
= control target key end

     0   :  { %16 = vsyncpa [#allocation3], 0  ;;  %s1371_s0 = inlined_call_operand.vmem [shape: f32[8,2], index: 0, kind: input, shape index: {}]   ;;  %s1372_s1 = inlined_call_operand.vmem [shape: f32[8,2], index: 1, kind: input, shape index: {}]   ;;  %s1373_s2 = inlined_call_operand.vmem [shape: f32[2,256], index: 2, kind: input, shape index: {}]   ;;  %s1374_s3 = inlined_call_operand.vmem [shape: f32[2,256], index: 3, kind: input, shape index: {}]   ;;  %s1375_s4 = inlined_call_operand.vmem [shape: f32[1,256], index: 4, kind: input, shape index: {}]   ;;  %s1376_s5 = inlined_call_operand.hbm [shape: bf16[256,256], index: 5, kind: input, shape index: {}]   ;;  %s1377_s6 = inlined_call_operand.vmem [shape: f32[1,256], index: 6, kind: input, shape index: {}]   ;;  %s1378_s7 = inlined_call_operand.hbm [shape: bf16[256,256], index: 7, kind: input, shape index: {}]   ;;  %s1379_s8 = inlined_call_operand.vmem [shape: f32[1,256], index: 8, kind: input, shape index: {}]   ;;  %s1380_s9 = inlined_call_operand.hbm [shape: bf16[256,128], index: 9, kind: input, shape index: {}]   ;;  %s1381_s10 = inlined_call_operand.vmem [shape: f32[1,128], index: 10, kind: input, shape index: {}]   ;;  %s1382_s11 = inlined_call_operand.hbm [shape: f32[8,128], index: 11, kind: output, shape index: {}]  }
   0x1   :  { %17 = vsyncpa [#allocation6], 0 }
   0x2   :  { %18 = vsyncpa [#allocation4], 0  ;;  %s1198_s17 = smov [#allocation5]   ;;  %s1199_s19 = smov [#allocation2]  }
   0x3   :  { %s48_s18 = sshll.u32 %s1198_s17, 4  ;;  %s34_s20 = sshll.u32 %s1199_s19, 4  ;;  %s49_s18 = int_to_ptr.vmem [resolvable:$true] %s48_s18  ;;  %s1268_s20 = int_to_ptr.vmem [resolvable:$true] %s34_s20 }
   0x4   :  { %s1104_s23 = scalar_lea.hbm %s1378_s7, 4096 }
   0x5   :  { %p1105_p0 = scmp.ne.s32.totalorder %s1378_s7, %s1104_s23  ;;  %p1108_p1 = scmp.lt.u32.totalorder %s1104_s23, %s1378_s7 }
   0x7   :  { %p1110_p2 = pnand %p1108_p1, %p1105_p0 }
   0x9   :  { %1113 = shalt.err (!%p1110_p2)
}
   0xa   :  { %s1114_s28 = scalar_lea.vmem %s49_s18, 4096  ;;  %p1119_p4 = scmp.lt.s32.totalorder %s49_s18, %s49_s18 }
   0xb   :  { %p1115_p3 = scmp.ne.s32.totalorder %s49_s18, %s1114_s28  ;;  %p1120_p5 = scmp.lt.s32.totalorder %s1114_s28, %s1114_s28 }
   0xd   :  { %p1121_p6 = por %p1120_p5, %p1119_p4 }
   0xf   :  { %p1122_p7 = pnand %p1121_p6, %p1115_p3 }
  0x11   :  { %1125 = shalt.err (!%p1122_p7)
}
  0x12   :  { %s1200_s29 = smov 128   ;;  %s1201_s30 = smov 8  }
  0x13   :  { %54 = dma.hbm_to_vmem [thread:$0]  %s1378_s7, 4096, %s49_s18, [#allocation6], %s1200_s29, %s1200_s29, %s1201_s30  }
  0x14   :  { %s1126_s16 = scalar_lea.hbm %s1376_s5, 4096 }
  0x15   :  { %p1127_p8 = scmp.ne.s32.totalorder %s1376_s5, %s1126_s16  ;;  %p1130_p9 = scmp.lt.u32.totalorder %s1126_s16, %s1376_s5 }
  0x17   :  { %p1132_p10 = pnand %p1130_p9, %p1127_p8 }
  0x19   :  { %1135 = shalt.err (!%p1132_p10)
}
  0x1a   :  { %s1136_s23 = scalar_lea.vmem %s1268_s20, 4096  ;;  %p1141_p12 = scmp.lt.s32.totalorder %s1268_s20, %s1268_s20 }
  0x1b   :  { %p1137_p11 = scmp.ne.s32.totalorder %s1268_s20, %s1136_s23  ;;  %p1142_p13 = scmp.lt.s32.totalorder %s1136_s23, %s1136_s23 }
  0x1d   :  { %p1143_p0 = por %p1142_p13, %p1141_p12 }
  0x1f   :  { %p1144_p1 = pnand %p1143_p0, %p1137_p11 }
  0x21   :  { %1147 = shalt.err (!%p1144_p1)
}
  0x22   :  { %40 = dma.hbm_to_vmem [thread:$0]  %s1376_s5, 4096, %s1268_s20, [#allocation3], %s1200_s29, %s1200_s29, %s1201_s30  }
  0x23   :  { %s1202_s24 = smov [#allocation7]   ;;  %s1148_s28 = scalar_lea.hbm %s1380_s9, 2048 }
  0x24   :  { %s62_s25 = sshll.u32 %s1202_s24, 4  ;;  %p1149_p2 = scmp.ne.s32.totalorder %s1380_s9, %s1148_s28  ;;  %s63_s25 = int_to_ptr.vmem [resolvable:$true] %s62_s25 }
  0x25   :  { %p1152_p3 = scmp.lt.u32.totalorder %s1148_s28, %s1380_s9 }
  0x27   :  { %p1154_p4 = pnand %p1152_p3, %p1149_p2 }
  0x29   :  { %1157 = shalt.err (!%p1154_p4)
}
  0x2a   :  { %s1158_s16 = scalar_lea.vmem %s63_s25, 2048  ;;  %p1163_p6 = scmp.lt.s32.totalorder %s63_s25, %s63_s25 }
  0x2b   :  { %p1159_p5 = scmp.ne.s32.totalorder %s63_s25, %s1158_s16  ;;  %p1164_p7 = scmp.lt.s32.totalorder %s1158_s16, %s1158_s16 }
  0x2d   :  { %p1165_p8 = por %p1164_p7, %p1163_p6 }
  0x2f   :  { %p1166_p9 = pnand %p1165_p8, %p1159_p5 }
  0x31   :  { %1169 = shalt.err (!%p1166_p9)
}
  0x32   :  { %s1203_s5 = smov 64   ;;  %s1204_s20 = smov 4  }
  0x33   :  { %68 = dma.hbm_to_vmem [thread:$0]  %s1380_s9, 2048, %s63_s25, [#allocation6], %s1203_s5, %s1203_s5, %s1204_s20  }
  0x34   :  { %1192 = dma.done.wait [#allocation3], 4096  }
  0x35   :  { %1193 = vsyncadd [#allocation3], 4294963200 }
  0x36   :  { %1194 = dma.done.wait [#allocation6], 6144  }
  0x37   :  { %1195 = vsyncadd [#allocation6], 4294961152  ;;  %v1205_v0 = vmov 0   ;;  %v81_v1 = vld [vmem:[%s1371_s0] sm:$0xff]  ;;  %v995_v5 = vld [vmem:[#allocation2 + $0x14] ss:$8 sps:$4 sm:$0xff]  }
  0x38   :  { %988 = vset.pattern.permute.xlu0 %v1205_v0  ;;  %990 = vset.pattern.permute.xlu1 %v1205_v0  ;;  %v82_v2 = vld [vmem:[%s1372_s1] sm:$0xff]  ;;  %v997_v6 = vld [vmem:[#allocation2 + $0x10] ss:$8 sps:$4 sm:$0xff]   ;;  %v1206_v7 = vmov 1   ;;  %v1001_v10 = vld [vmem:[#allocation2 + $0x34] ss:$8 sps:$4 sm:$0xff]   ;;  %v91_v0 = vlaneseq }
  0x39   :  { %87 = vperm.xlu0 %988, %v81_v1   ;;  %140 = vperm.xlu1 %990, %v82_v2   ;;  %v992_v3 = vld [vmem:[#allocation2 + $0x4] ss:$8 sps:$4 sm:$0xff]   ;;  %v994_v4 = vld [vmem:[#allocation2] ss:$8 sps:$4 sm:$0xff]   ;;  %v1003_v11 = vld [vmem:[#allocation2 + $0x30] ss:$8 sps:$4 sm:$0xff]  }
  0x3a   :  { %387 = vmatprep.subr.bf16.mxu0 %v992_v3  ;;  %v998_v8 = vld [vmem:[#allocation2 + $0x24] ss:$8 sps:$4 sm:$0xff]   ;;  %v1000_v9 = vld [vmem:[#allocation2 + $0x20] ss:$8 sps:$4 sm:$0xff]   ;;  %v1007_v14 = vld [vmem:[#allocation2 + $0x54] ss:$8 sps:$4 sm:$0xff]  }
  0x3b   :  { %388 = vmatpush1.bf16.msra.mxu0 %v994_v4  ;;  %v1004_v12 = vld [vmem:[#allocation2 + $0x44] ss:$8 sps:$4 sm:$0xff]   ;;  %v1006_v13 = vld [vmem:[#allocation2 + $0x40] ss:$8 sps:$4 sm:$0xff]   ;;  %v1009_v15 = vld [vmem:[#allocation2 + $0x50] ss:$8 sps:$4 sm:$0xff]  }
  0x3c   :  { %389 = vmatprep.subr.bf16.mxu0 %v995_v5  ;;  %v1010_v16 = vld [vmem:[#allocation2 + $0x64] ss:$8 sps:$4 sm:$0xff]   ;;  %v1012_v17 = vld [vmem:[#allocation2 + $0x60] ss:$8 sps:$4 sm:$0xff]   ;;  %v1013_v18 = vld [vmem:[#allocation2 + $0x74] ss:$8 sps:$4 sm:$0xff]  }
  0x3d   :  { %989 = vset.pattern.permute.xlu0 %v1206_v7  ;;  %991 = vset.pattern.permute.xlu1 %v1206_v7  ;;  %v1040_v19 = vld [vmem:[#allocation5 + $0x4] ss:$8 sps:$4 sm:$0xff]   ;;  %v1042_v20 = vld [vmem:[#allocation5] ss:$8 sps:$4 sm:$0xff]   ;;  %v1043_v21 = vld [vmem:[#allocation5 + $0x14] ss:$8 sps:$4 sm:$0xff]  }
  0x3e   :  { %119 = vperm.xlu0 %989, %v81_v1   ;;  %161 = vperm.xlu1 %991, %v82_v2   ;;  %v1015_v22 = vld [vmem:[#allocation2 + $0x70] ss:$8 sps:$4 sm:$0xff]   ;;  %v1046_v24 = vld [vmem:[#allocation5 + $0x24] ss:$8 sps:$4 sm:$0xff]   ;;  %v1018_v26 = vld [vmem:[#allocation2 + $0x80] ss:$8 sps:$4 sm:$0xff]  }
  0x3f   :  { %390 = vmatpush1.bf16.msra.mxu0 %v997_v6  ;;  %636 = vmatprep.subr.bf16.mxu1 %v1040_v19  ;;  %v1045_v23 = vld [vmem:[#allocation5 + $0x10] ss:$8 sps:$4 sm:$0xff]   ;;  %v1016_v25 = vld [vmem:[#allocation2 + $0x84] ss:$8 sps:$4 sm:$0xff]   ;;  %v1048_v27 = vld [vmem:[#allocation5 + $0x20] ss:$8 sps:$4 sm:$0xff]  }
  0x40   :  { %391 = vmatprep.subr.bf16.mxu0 %v998_v8  ;;  %637 = vmatpush1.bf16.msra.mxu1 %v1042_v20  ;;  %v1049_v28 = vld [vmem:[#allocation5 + $0x34] ss:$8 sps:$4 sm:$0xff]   ;;  %v1021_v30 = vld [vmem:[#allocation2 + $0x90] ss:$8 sps:$4 sm:$0xff]   ;;  %v1052_v32 = vld [vmem:[#allocation5 + $0x44] ss:$8 sps:$4 sm:$0xff]  }
  0x41   :  { %638 = vmatprep.subr.bf16.mxu1 %v1043_v21  ;;  %v1019_v29 = vld [vmem:[#allocation2 + $0x94] ss:$8 sps:$4 sm:$0xff]   ;;  %v1051_v31 = vld [vmem:[#allocation5 + $0x30] ss:$8 sps:$4 sm:$0xff]   ;;  %v1022_v33 = vld [vmem:[#allocation2 + $0xa4] ss:$8 sps:$4 sm:$0xff]  }
  0x42   :  { %v1024_v34 = vld [vmem:[#allocation2 + $0xa0] ss:$8 sps:$4 sm:$0xff]   ;;  %v1055_v36 = vld [vmem:[#allocation5 + $0x54] ss:$8 sps:$4 sm:$0xff]   ;;  %v1027_v38 = vld [vmem:[#allocation2 + $0xb0] ss:$8 sps:$4 sm:$0xff]  }
  0x43   :  { %392 = vmatpush1.bf16.msra.mxu0 %v1000_v9  ;;  %v1054_v35 = vld [vmem:[#allocation5 + $0x40] ss:$8 sps:$4 sm:$0xff]   ;;  %v1025_v37 = vld [vmem:[#allocation2 + $0xb4] ss:$8 sps:$4 sm:$0xff]   ;;  %v1057_v39 = vld [vmem:[#allocation5 + $0x50] ss:$8 sps:$4 sm:$0xff]  }
  0x44   :  { %393 = vmatprep.subr.bf16.mxu0 %v1001_v10  ;;  %639 = vmatpush1.bf16.msra.mxu1 %v1045_v23  ;;  %v1058_v40 = vld [vmem:[#allocation5 + $0x64] ss:$8 sps:$4 sm:$0xff]   ;;  %v1060_v42 = vld [vmem:[#allocation5 + $0x60] ss:$8 sps:$4 sm:$0xff]   ;;  %v1061_v44 = vld [vmem:[#allocation5 + $0x74] ss:$8 sps:$4 sm:$0xff]  }
  0x45   :  { %640 = vmatprep.subr.bf16.mxu1 %v1046_v24  ;;  %v1028_v41 = vld [vmem:[#allocation2 + $0xc4] ss:$8 sps:$4 sm:$0xff]   ;;  %v1030_v43 = vld [vmem:[#allocation2 + $0xc0] ss:$8 sps:$4 sm:$0xff]   ;;  %v1031_v45 = vld [vmem:[#allocation2 + $0xd4] ss:$8 sps:$4 sm:$0xff]  }
  0x46   :  { %v1063_v46 = vld [vmem:[#allocation5 + $0x70] ss:$8 sps:$4 sm:$0xff]   ;;  %v1064_v48 = vld [vmem:[#allocation5 + $0x84] ss:$8 sps:$4 sm:$0xff]   ;;  %v1066_v50 = vld [vmem:[#allocation5 + $0x80] ss:$8 sps:$4 sm:$0xff]  }
  0x47   :  { %394 = vmatpush1.bf16.msra.mxu0 %v1003_v11  ;;  %v1033_v47 = vld [vmem:[#allocation2 + $0xd0] ss:$8 sps:$4 sm:$0xff]   ;;  %v1034_v49 = vld [vmem:[#allocation2 + $0xe4] ss:$8 sps:$4 sm:$0xff]   ;;  %v1036_v51 = vld [vmem:[#allocation2 + $0xe0] ss:$8 sps:$4 sm:$0xff]  }
  0x48   :  { %395 = vmatprep.subr.bf16.mxu0 %v1004_v12  ;;  %641 = vmatpush1.bf16.msra.mxu1 %v1048_v27  ;;  %v1067_v52 = vld [vmem:[#allocation5 + $0x94] ss:$8 sps:$4 sm:$0xff]   ;;  %v1069_v54 = vld [vmem:[#allocation5 + $0x90] ss:$8 sps:$4 sm:$0xff]   ;;  %v1070_v56 = vld [vmem:[#allocation5 + $0xa4] ss:$8 sps:$4 sm:$0xff]  }
  0x49   :  { %642 = vmatprep.subr.bf16.mxu1 %v1049_v28  ;;  %v1037_v53 = vld [vmem:[#allocation2 + $0xf4] ss:$8 sps:$4 sm:$0xff]   ;;  %v1039_v55 = vld [vmem:[#allocation2 + $0xf0] ss:$8 sps:$4 sm:$0xff]   ;;  %v1072_v57 = vld [vmem:[#allocation5 + $0xa0] ss:$8 sps:$4 sm:$0xff]  }
  0x4a   :  { %v1073_v58 = vld [vmem:[#allocation5 + $0xb4] ss:$8 sps:$4 sm:$0xff]   ;;  %v1075_v59 = vld [vmem:[#allocation5 + $0xb0] ss:$8 sps:$4 sm:$0xff]   ;;  %v1076_v60 = vld [vmem:[#allocation5 + $0xc4] ss:$8 sps:$4 sm:$0xff]  }
  0x4b   :  { %396 = vmatpush1.bf16.msra.mxu0 %v1006_v13  ;;  %v1078_v61 = vld [vmem:[#allocation5 + $0xc0] ss:$8 sps:$4 sm:$0xff]   ;;  %v1079_v62 = vld [vmem:[#allocation5 + $0xd4] ss:$8 sps:$4 sm:$0xff]   ;;  %v1081_v63 = vld [vmem:[#allocation5 + $0xd0] ss:$8 sps:$4 sm:$0xff]  }
  0x4c   :  { %397 = vmatprep.subr.bf16.mxu0 %v1007_v14  ;;  %643 = vmatpush1.bf16.msra.mxu1 %v1051_v31  ;;  %v92_v1 = vshrl.u32 %v91_v0, 7  ;;  %v84_v4 = vld [vmem:[%s1373_s2] ss:$2 sm:$0x3] }
  0x4d   :  { %644 = vmatprep.subr.bf16.mxu1 %v1052_v32  ;;  %v83_v5 = vld [vmem:[%s1375_s4] sm:$0x3] }
  0x4e   :  { %v1317_v2 = vsub.s32 0, %v92_v1  ;;  %v1319_v3 = vsub.s32 1, %v92_v1  ;;  %v873_v8 = vld [vmem:[%s1373_s2 + $0x1] ss:$2 sm:$0x3] }
  0x4f   :  { %398 = vmatpush1.bf16.msra.mxu0 %v1009_v15  ;;  %v137_v10 = vld [vmem:[%s1374_s3] ss:$2 sm:$0x3]  ;;  %v874_v14 = vld [vmem:[%s1374_s3 + $0x1] ss:$2 sm:$0x3] }
  0x50   :  { %399 = vmatprep.subr.bf16.mxu0 %v1010_v16  ;;  %645 = vmatpush1.bf16.msra.mxu1 %v1054_v35  ;;  %v94_v6 = vrot.slane %v84_v4, %v1317_v2  ;;  %v98_v7 = vrot.slane %v84_v4, %v1319_v3  ;;  %v107_v12 = vrot.slane %v83_v5, %v1317_v2 }
  0x51   :  { %646 = vmatprep.subr.bf16.mxu1 %v1055_v36  ;;  %v111_v13 = vrot.slane %v83_v5, %v1319_v3  ;;  %v147_v19 = vrot.slane %v137_v10, %v1317_v2  ;;  %v151_v20 = vrot.slane %v137_v10, %v1319_v3  ;;  %v168_v21 = vrot.slane %v874_v14, %v1317_v2  ;;  %v1100_v10 = vld [vmem:[#allocation7 + $0x70] sm:$0xff]  }
  0x53   :  { %400 = vmatpush1.bf16.msra.mxu0 %v1012_v17  ;;  %v126_v17 = vrot.slane %v873_v8, %v1317_v2 }
  0x54   :  { %401 = vmatprep.subr.bf16.mxu0 %v1013_v18  ;;  %647 = vmatpush1.bf16.msra.mxu1 %v1057_v39  ;;  %v130_v18 = vrot.slane %v873_v8, %v1319_v3 }
  0x55   :  { %648 = vmatprep.subr.bf16.mxu1 %v1058_v40 }
  0x57   :  { %402 = vmatpush1.bf16.msra.mxu0 %v1015_v22  ;;  %v172_v22 = vrot.slane %v874_v14, %v1319_v3  ;;  %v464_v14 = vld [vmem:[%s1379_s8] sm:$0x3]  ;;  %s1207_s8 = smov [#allocation8]  }
  0x58   :  { %403 = vmatprep.subr.bf16.mxu0 %v1016_v25  ;;  %649 = vmatpush1.bf16.msra.mxu1 %v1060_v42  ;;  %s863_s13 = sshll.u32 %s1207_s8, 4  ;;  %s864_s13 = int_to_ptr.vmem [resolvable:$true] %s863_s13 }
  0x59   :  { %650 = vmatprep.subr.bf16.mxu1 %v1061_v44  ;;  %v1084_v44 = vld [vmem:[#allocation5 + $0xe0] ss:$8 sps:$4 sm:$0xff]   ;;  %s1170_s14 = scalar_lea.vmem %s864_s13, 128  ;;  %p1175_p11 = scmp.lt.s32.totalorder %s864_s13, %s864_s13 }
  0x5a   :  { %p1171_p10 = scmp.ne.s32.totalorder %s864_s13, %s1170_s14  ;;  %p1176_p12 = scmp.lt.s32.totalorder %s1170_s14, %s1170_s14 }
  0x5b   :  { %404 = vmatpush1.bf16.msra.mxu0 %v1018_v26 }
  0x5c   :  { %405 = vmatprep.subr.bf16.mxu0 %v1019_v29  ;;  %651 = vmatpush1.bf16.msra.mxu1 %v1063_v46  ;;  %v1087_v46 = vld [vmem:[#allocation5 + $0xf0] ss:$8 sps:$4 sm:$0xff]   ;;  %p1177_p13 = por %p1176_p12, %p1175_p11 }
  0x5d   :  { %652 = vmatprep.subr.bf16.mxu1 %v1064_v48  ;;  %v1089_v48 = vld [vmem:[#allocation7] sm:$0xff]  }
  0x5e   :  { %p1178_p0 = pnand %p1177_p13, %p1171_p10 }
  0x5f   :  { %406 = vmatpush1.bf16.msra.mxu0 %v1021_v30 }
  0x60   :  { %407 = vmatprep.subr.bf16.mxu0 %v1022_v33  ;;  %653 = vmatpush1.bf16.msra.mxu1 %v1066_v50  ;;  %v1091_v50 = vld [vmem:[#allocation7 + $0x8] sm:$0xff]  }
  0x61   :  { %654 = vmatprep.subr.bf16.mxu1 %v1067_v52  ;;  %v1093_v52 = vld [vmem:[#allocation7 + $0x10] sm:$0xff]  }
  0x63   :  { %408 = vmatpush1.bf16.msra.mxu0 %v1024_v34 }
  0x64   :  { %409 = vmatprep.subr.bf16.mxu0 %v1025_v37  ;;  %655 = vmatpush1.bf16.msra.mxu1 %v1069_v54  ;;  %v1095_v54 = vld [vmem:[#allocation7 + $0x18] sm:$0xff]  }
  0x65   :  { %656 = vmatprep.subr.bf16.mxu1 %v1070_v56  ;;  %v1097_v56 = vld [vmem:[#allocation7 + $0x20] sm:$0xff]  }
  0x67   :  { %410 = vmatpush1.bf16.msra.mxu0 %v1027_v38 }
  0x68   :  { %411 = vmatprep.subr.bf16.mxu0 %v1028_v41  ;;  %657 = vmatpush1.bf16.msra.mxu1 %v1072_v57  ;;  %v1098_v57 = vld [vmem:[#allocation7 + $0x68] sm:$0xff]  }
  0x69   :  { %658 = vmatprep.subr.bf16.mxu1 %v1073_v58  ;;  %v1099_v58 = vld [vmem:[#allocation7 + $0x28] sm:$0xff]  }
  0x6b   :  { %412 = vmatpush1.bf16.msra.mxu0 %v1030_v43  ;;  %v1082_v43 = vld [vmem:[#allocation5 + $0xe4] ss:$8 sps:$4 sm:$0xff]  }
  0x6c   :  { %413 = vmatprep.subr.bf16.mxu0 %v1031_v45  ;;  %659 = vmatpush1.bf16.msra.mxu1 %v1075_v59  ;;  %v1085_v45 = vld [vmem:[#allocation5 + $0xf4] ss:$8 sps:$4 sm:$0xff]   ;;  %v215_v59 = vld [vmem:[%s1377_s6] sm:$0x3] }
  0x6d   :  { %660 = vmatprep.subr.bf16.mxu1 %v1076_v60  ;;  %v220_v60 = vrot.slane %v215_v59, %v1317_v2 }
  0x6f   :  { %414 = vmatpush1.bf16.msra.mxu0 %v1033_v47  ;;  %v1088_v47 = vld [vmem:[#allocation7 + $0x40] sm:$0xff]  }
  0x70   :  { %415 = vmatprep.subr.bf16.mxu0 %v1034_v49  ;;  %661 = vmatpush1.bf16.msra.mxu1 %v1078_v61  ;;  %v1090_v49 = vld [vmem:[#allocation7 + $0x48] sm:$0xff]   ;;  %v224_v61 = vrot.slane %v215_v59, %v1319_v3 }
  0x71   :  { %662 = vmatprep.subr.bf16.mxu1 %v1079_v62 }
  0x73   :  { %416 = vmatpush1.bf16.msra.mxu0 %v1036_v51  ;;  %v1092_v51 = vld [vmem:[#allocation7 + $0x50] sm:$0xff]  }
  0x74   :  { %417 = vmatprep.subr.bf16.mxu0 %v1037_v53  ;;  %663 = vmatpush1.bf16.msra.mxu1 %v1081_v63  ;;  %v1094_v53 = vld [vmem:[#allocation7 + $0x58] sm:$0xff]  }
  0x75   :  { %664 = vmatprep.subr.bf16.mxu1 %v1082_v43 }
  0x77   :  { %418 = vmatpush1.bf16.msra.mxu0 %v1039_v55  ;;  %v1096_v55 = vld [vmem:[#allocation7 + $0x60] sm:$0xff]  }
  0x78   :  { %665 = vmatpush1.bf16.msra.mxu1 %v1084_v44  ;;  %956 = vmatprep.subr.bf16.mxu0 %v1088_v47 }
  0x79   :  { %666 = vmatprep.subr.bf16.mxu1 %v1085_v45 }
  0x7c   :  { %667 = vmatpush1.bf16.msra.mxu1 %v1087_v46 }
  0xb8   :  { %v88_v9 = vpop.permute.xlu0 %87  ;;  %v141_v11 = vpop.permute.xlu1 %140 }
  0xb9   :  { %v101_v15 = vmul.f32 %v94_v6, %v88_v9  ;;  %v102_v16 = vmul.f32 %v98_v7, %v88_v9  ;;  %v154_v29 = vmul.f32 %v147_v19, %v141_v11  ;;  %v155_v30 = vmul.f32 %v151_v20, %v141_v11  ;;  %v1101_v11 = vld [vmem:[#allocation7 + $0x30] sm:$0xff]  }
  0xbb   :  { %v114_v25 = vadd.f32 %v107_v12, %v101_v15  ;;  %v115_v26 = vadd.f32 %v111_v13, %v102_v16  ;;  %v1102_v12 = vld [vmem:[#allocation7 + $0x78] sm:$0xff]   ;;  %v469_v15 = vrot.slane %v464_v14, %v1317_v2  ;;  %v473_v16 = vrot.slane %v464_v14, %v1319_v3 }
  0xbc   :  { %v1103_v13 = vld [vmem:[#allocation7 + $0x38] sm:$0xff]  }
  0xbd   :  { %v120_v23 = vpop.permute.xlu0 %119  ;;  %v162_v24 = vpop.permute.xlu1 %161 }
  0xbe   :  { %v133_v27 = vmul.f32 %v126_v17, %v120_v23  ;;  %v134_v28 = vmul.f32 %v130_v18, %v120_v23  ;;  %v175_v33 = vmul.f32 %v168_v21, %v162_v24  ;;  %v176_v34 = vmul.f32 %v172_v22, %v162_v24 }
  0xc0   :  { %v135_v31 = vadd.f32 %v133_v27, %v114_v25  ;;  %v136_v32 = vadd.f32 %v134_v28, %v115_v26  ;;  %v939_v28 = vld [vmem:[%s1381_s10] ss:$0 sm:$0xff] }
  0xc2   :  { %v156_v35 = vadd.f32 %v154_v29, %v135_v31  ;;  %v157_v36 = vadd.f32 %v155_v30, %v136_v32 }
  0xc4   :  { %v177_v37 = vadd.f32 %v175_v33, %v156_v35  ;;  %v178_v38 = vadd.f32 %v176_v34, %v157_v36 }
  0xc6   :  { %v179_v39 = vmax.f32 %v177_v37, 0.0  ;;  %v180_v40 = vmax.f32 %v178_v38, 0.0 }
  0xc8   :  { %v181_v41 = vpack.c.bf16 %v179_v39, %v179_v39  ;;  %v182_v42 = vpack.c.bf16 %v180_v40, %v180_v40 }
  0xca   :  { %419 = vmatprep.mubr.bf16.mxu0 %v182_v42 }
  0xcb   :  { %420 = vmatmul.mubr.bf16.vlgmr.msra.gmra.mrb[0].mxu0 %v181_v41 }
  0xcc   :  { %957 = vmatpush3.bf16.msra.mxu0 %v1089_v48 }
  0xcd   :  { %958 = vmatprep.subr.bf16.mxu0 %v1090_v49 }
  0xd0   :  { %959 = vmatpush3.bf16.msra.mxu0 %v1091_v50 }
  0xd1   :  { %960 = vmatprep.subr.bf16.mxu0 %v1092_v51 }
  0xd4   :  { %961 = vmatpush3.bf16.msra.mxu0 %v1093_v52 }
  0xd5   :  { %962 = vmatprep.subr.bf16.mxu0 %v1094_v53 }
  0xd8   :  { %963 = vmatpush3.bf16.msra.mxu0 %v1095_v54 }
  0xd9   :  { %964 = vmatprep.subr.bf16.mxu0 %v1096_v55 }
  0xdc   :  { %965 = vmatpush3.bf16.msra.mxu0 %v1097_v56 }
  0xdd   :  { %966 = vmatprep.subr.bf16.mxu0 %v1098_v57 }
  0xe0   :  { %967 = vmatpush3.bf16.msra.mxu0 %v1099_v58 }
  0xe1   :  { %968 = vmatprep.subr.bf16.mxu0 %v1100_v10 }
  0xe4   :  { %969 = vmatpush3.bf16.msra.mxu0 %v1101_v11 }
  0xe5   :  { %970 = vmatprep.subr.bf16.mxu0 %v1102_v12 }
  0xe8   :  { %971 = vmatpush3.bf16.msra.mxu0 %v1103_v13 }
 0x19e   :  { %v421_v62 = vpop.f32.mrb[0].mxu0 }
 0x19f   :  { %v422_v63 = vadd.f32 %v421_v62, %v220_v60  ;;  %v423_v0 = vpop.f32.mrb[1].mxu0 }
 0x1a0   :  { %v424_v1 = vadd.f32 %v423_v0, %v224_v61  ;;  %v425_v4 = vpop.f32.mrb[2].mxu0 }
 0x1a1   :  { %v428_v5 = vmax.f32 %v422_v63, 0.0  ;;  %v426_v6 = vpop.f32.mrb[3].mxu0 }
 0x1a2   :  { %v429_v7 = vmax.f32 %v424_v1, 0.0 }
 0x1a3   :  { %v430_v9 = vpack.c.bf16 %v428_v5, %v428_v5 }
 0x1a4   :  { %v431_v8 = vpack.c.bf16 %v429_v7, %v429_v7 }
 0x1a6   :  { %668 = vmatprep.mubr.bf16.mxu1 %v431_v8 }
 0x1a7   :  { %669 = vmatmul.mubr.bf16.vlgmr.msra.gmra.mrb[0].mxu1 %v430_v9 }
 0x27a   :  { %v670_v17 = vpop.f32.mrb[0].mxu1 }
 0x27b   :  { %v671_v18 = vadd.f32 %v670_v17, %v469_v15  ;;  %v672_v19 = vpop.f32.mrb[1].mxu1 }
 0x27c   :  { %v673_v20 = vadd.f32 %v672_v19, %v473_v16  ;;  %v674_v21 = vpop.f32.mrb[2].mxu1 }
 0x27d   :  { %v677_v22 = vmax.f32 %v671_v18, 0.0  ;;  %v675_v23 = vpop.f32.mrb[3].mxu1 }
 0x27e   :  { %v678_v24 = vmax.f32 %v673_v20, 0.0 }
 0x27f   :  { %v679_v26 = vpack.c.bf16 %v677_v22, %v677_v22 }
 0x280   :  { %v680_v25 = vpack.c.bf16 %v678_v24, %v678_v24 }
 0x282   :  { %848 = vmatprep.mubr.bf16.mxu0 %v680_v25 }
 0x283   :  { %849 = vmatmul.mubr.bf16.vlgmr.msra.gmra.mrb[4].mxu0 %v679_v26 }
 0x356   :  { %v972_v27 = vpop.f32.mrb[4].mxu0 }
 0x357   :  { %v973_v2 = vpop.f32.mrb[5].mxu0 }
 0x358   :  { %v974_v3 = vadd.f32 %v973_v2, %v972_v27  ;;  %v975_v29 = vpop.f32.mrb[6].mxu0 }
 0x359   :  { %v976_v30 = vpop.f32.mrb[7].mxu0 }
 0x35a   :  { %v851_v31 = vadd.f32 %v974_v3, %v939_v28 }
 0x35c   :  { %856 = vst [vmem:[#allocation8] sm:$0xff] %v851_v31 }
 0x35d   :  { %1181 = shalt.err (!%p1178_p0)
}
 0x35e   :  { %s1182_s10 = scalar_lea.hbm %s1382_s11, 128 }
 0x35f   :  { %p1183_p1 = scmp.ne.s32.totalorder %s1382_s11, %s1182_s10  ;;  %p1186_p2 = scmp.lt.u32.totalorder %s1182_s10, %s1382_s11 }
 0x361   :  { %p1188_p3 = pnand %p1186_p2, %p1183_p1 }
 0x363   :  { %1191 = shalt.err (!%p1188_p3)
}
 0x364   :  { %866 = dma.vmem_to_hbm [thread:$0]  %s864_s13, 128, %s1382_s11, [#allocation4]  }
 0x365   :  { %1196 = dma.done.wait [#allocation4], 128  }
 0x366   :  { %1197 = vsyncadd [#allocation4], 4294967168 }
 0x367   :  { %870 = vsyncpa [#allocation3], 1 }
 0x368   :  { %871 = vsyncpa [#allocation6], 1 }
 0x369   :  { %872 = vsyncpa [#allocation4], 1 }

// kernel: tpu_custom_call.1
= control target key start
LH: loop header
LB: loop body
LE: loop exit
PB: predicated region body
PF: predicated region fallthrough
CT: control target
= control target key end

     0   :  { %16 = vsyncpa [#allocation3], 0  ;;  %s1371_s0 = inlined_call_operand.vmem [shape: f32[8,2], index: 0, kind: input, shape index: {}]   ;;  %s1372_s1 = inlined_call_operand.vmem [shape: f32[8,2], index: 1, kind: input, shape index: {}]   ;;  %s1373_s2 = inlined_call_operand.vmem [shape: f32[2,256], index: 2, kind: input, shape index: {}]   ;;  %s1374_s3 = inlined_call_operand.vmem [shape: f32[2,256], index: 3, kind: input, shape index: {}]   ;;  %s1375_s4 = inlined_call_operand.vmem [shape: f32[1,256], index: 4, kind: input, shape index: {}]   ;;  %s1376_s5 = inlined_call_operand.hbm [shape: bf16[256,256], index: 5, kind: input, shape index: {}]   ;;  %s1377_s6 = inlined_call_operand.vmem [shape: f32[1,256], index: 6, kind: input, shape index: {}]   ;;  %s1378_s7 = inlined_call_operand.hbm [shape: bf16[256,256], index: 7, kind: input, shape index: {}]   ;;  %s1379_s8 = inlined_call_operand.vmem [shape: f32[1,256], index: 8, kind: input, shape index: {}]   ;;  %s1380_s9 = inlined_call_operand.hbm [shape: bf16[256,128], index: 9, kind: input, shape index: {}]   ;;  %s1381_s10 = inlined_call_operand.vmem [shape: f32[1,128], index: 10, kind: input, shape index: {}]   ;;  %s1382_s11 = inlined_call_operand.hbm [shape: f32[8,128], index: 11, kind: output, shape index: {}]  }
   0x1   :  { %17 = vsyncpa [#allocation6], 0 }
   0x2   :  { %18 = vsyncpa [#allocation4], 0  ;;  %s1198_s17 = smov [#allocation5]   ;;  %s1199_s19 = smov [#allocation2]  }
   0x3   :  { %s48_s18 = sshll.u32 %s1198_s17, 4  ;;  %s34_s20 = sshll.u32 %s1199_s19, 4  ;;  %s49_s18 = int_to_ptr.vmem [resolvable:$true] %s48_s18  ;;  %s1268_s20 = int_to_ptr.vmem [resolvable:$true] %s34_s20 }
   0x4   :  { %s1104_s23 = scalar_lea.hbm %s1378_s7, 4096 }
   0x5   :  { %p1105_p0 = scmp.ne.s32.totalorder %s1378_s7, %s1104_s23  ;;  %p1108_p1 = scmp.lt.u32.totalorder %s1104_s23, %s1378_s7 }
   0x7   :  { %p1110_p2 = pnand %p1108_p1, %p1105_p0 }
   0x9   :  { %1113 = shalt.err (!%p1110_p2)
}
   0xa   :  { %s1114_s28 = scalar_lea.vmem %s49_s18, 4096  ;;  %p1119_p4 = scmp.lt.s32.totalorder %s49_s18, %s49_s18 }
   0xb   :  { %p1115_p3 = scmp.ne.s32.totalorder %s49_s18, %s1114_s28  ;;  %p1120_p5 = scmp.lt.s32.totalorder %s1114_s28, %s1114_s28 }
   0xd   :  { %p1121_p6 = por %p1120_p5, %p1119_p4 }
   0xf   :  { %p1122_p7 = pnand %p1121_p6, %p1115_p3 }
  0x11   :  { %1125 = shalt.err (!%p1122_p7)
}
  0x12   :  { %s1200_s29 = smov 128   ;;  %s1201_s30 = smov 8  }
  0x13   :  { %54 = dma.hbm_to_vmem [thread:$0]  %s1378_s7, 4096, %s49_s18, [#allocation6], %s1200_s29, %s1200_s29, %s1201_s30  }
  0x14   :  { %s1126_s16 = scalar_lea.hbm %s1376_s5, 4096 }
  0x15   :  { %p1127_p8 = scmp.ne.s32.totalorder %s1376_s5, %s1126_s16  ;;  %p1130_p9 = scmp.lt.u32.totalorder %s1126_s16, %s1376_s5 }
  0x17   :  { %p1132_p10 = pnand %p1130_p9, %p1127_p8 }
  0x19   :  { %1135 = shalt.err (!%p1132_p10)
}
  0x1a   :  { %s1136_s23 = scalar_lea.vmem %s1268_s20, 4096  ;;  %p1141_p12 = scmp.lt.s32.totalorder %s1268_s20, %s1268_s20 }
  0x1b   :  { %p1137_p11 = scmp.ne.s32.totalorder %s1268_s20, %s1136_s23  ;;  %p1142_p13 = scmp.lt.s32.totalorder %s1136_s23, %s1136_s23 }
  0x1d   :  { %p1143_p0 = por %p1142_p13, %p1141_p12 }
  0x1f   :  { %p1144_p1 = pnand %p1143_p0, %p1137_p11 }
  0x21   :  { %1147 = shalt.err (!%p1144_p1)
}
  0x22   :  { %40 = dma.hbm_to_vmem [thread:$0]  %s1376_s5, 4096, %s1268_s20, [#allocation3], %s1200_s29, %s1200_s29, %s1201_s30  }
  0x23   :  { %s1202_s24 = smov [#allocation7]   ;;  %s1148_s28 = scalar_lea.hbm %s1380_s9, 2048 }
  0x24   :  { %s62_s25 = sshll.u32 %s1202_s24, 4  ;;  %p1149_p2 = scmp.ne.s32.totalorder %s1380_s9, %s1148_s28  ;;  %s63_s25 = int_to_ptr.vmem [resolvable:$true] %s62_s25 }
  0x25   :  { %p1152_p3 = scmp.lt.u32.totalorder %s1148_s28, %s1380_s9 }
  0x27   :  { %p1154_p4 = pnand %p1152_p3, %p1149_p2 }
  0x29   :  { %1157 = shalt.err (!%p1154_p4)
}
  0x2a   :  { %s1158_s16 = scalar_lea.vmem %s63_s25, 2048  ;;  %p1163_p6 = scmp.lt.s32.totalorder %s63_s25, %s63_s25 }
  0x2b   :  { %p1159_p5 = scmp.ne.s32.totalorder %s63_s25, %s1158_s16  ;;  %p1164_p7 = scmp.lt.s32.totalorder %s1158_s16, %s1158_s16 }
  0x2d   :  { %p1165_p8 = por %p1164_p7, %p1163_p6 }
  0x2f   :  { %p1166_p9 = pnand %p1165_p8, %p1159_p5 }
  0x31   :  { %1169 = shalt.err (!%p1166_p9)
}
  0x32   :  { %s1203_s5 = smov 64   ;;  %s1204_s20 = smov 4  }
  0x33   :  { %68 = dma.hbm_to_vmem [thread:$0]  %s1380_s9, 2048, %s63_s25, [#allocation6], %s1203_s5, %s1203_s5, %s1204_s20  }
  0x34   :  { %1192 = dma.done.wait [#allocation3], 4096  }
  0x35   :  { %1193 = vsyncadd [#allocation3], 4294963200 }
  0x36   :  { %1194 = dma.done.wait [#allocation6], 6144  }
  0x37   :  { %1195 = vsyncadd [#allocation6], 4294961152  ;;  %v1205_v0 = vmov 0   ;;  %v81_v1 = vld [vmem:[%s1371_s0] sm:$0xff]  ;;  %v995_v5 = vld [vmem:[#allocation2 + $0x14] ss:$8 sps:$4 sm:$0xff]  }
  0x38   :  { %988 = vset.pattern.permute.xlu0 %v1205_v0  ;;  %990 = vset.pattern.permute.xlu1 %v1205_v0  ;;  %v82_v2 = vld [vmem:[%s1372_s1] sm:$0xff]  ;;  %v997_v6 = vld [vmem:[#allocation2 + $0x10] ss:$8 sps:$4 sm:$0xff]   ;;  %v1206_v7 = vmov 1   ;;  %v1001_v10 = vld [vmem:[#allocation2 + $0x34] ss:$8 sps:$4 sm:$0xff]   ;;  %v91_v0 = vlaneseq }
  0x39   :  { %87 = vperm.xlu0 %988, %v81_v1   ;;  %140 = vperm.xlu1 %990, %v82_v2   ;;  %v992_v3 = vld [vmem:[#allocation2 + $0x4] ss:$8 sps:$4 sm:$0xff]   ;;  %v994_v4 = vld [vmem:[#allocation2] ss:$8 sps:$4 sm:$0xff]   ;;  %v1003_v11 = vld [vmem:[#allocation2 + $0x30] ss:$8 sps:$4 sm:$0xff]  }
  0x3a   :  { %387 = vmatprep.subr.bf16.mxu0 %v992_v3  ;;  %v998_v8 = vld [vmem:[#allocation2 + $0x24] ss:$8 sps:$4 sm:$0xff]   ;;  %v1000_v9 = vld [vmem:[#allocation2 + $0x20] ss:$8 sps:$4 sm:$0xff]   ;;  %v1007_v14 = vld [vmem:[#allocation2 + $0x54] ss:$8 sps:$4 sm:$0xff]  }
  0x3b   :  { %388 = vmatpush1.bf16.msra.mxu0 %v994_v4  ;;  %v1004_v12 = vld [vmem:[#allocation2 + $0x44] ss:$8 sps:$4 sm:$0xff]   ;;  %v1006_v13 = vld [vmem:[#allocation2 + $0x40] ss:$8 sps:$4 sm:$0xff]   ;;  %v1009_v15 = vld [vmem:[#allocation2 + $0x50] ss:$8 sps:$4 sm:$0xff]  }
  0x3c   :  { %389 = vmatprep.subr.bf16.mxu0 %v995_v5  ;;  %v1010_v16 = vld [vmem:[#allocation2 + $0x64] ss:$8 sps:$4 sm:$0xff]   ;;  %v1012_v17 = vld [vmem:[#allocation2 + $0x60] ss:$8 sps:$4 sm:$0xff]   ;;  %v1013_v18 = vld [vmem:[#allocation2 + $0x74] ss:$8 sps:$4 sm:$0xff]  }
  0x3d   :  { %989 = vset.pattern.permute.xlu0 %v1206_v7  ;;  %991 = vset.pattern.permute.xlu1 %v1206_v7  ;;  %v1040_v19 = vld [vmem:[#allocation5 + $0x4] ss:$8 sps:$4 sm:$0xff]   ;;  %v1042_v20 = vld [vmem:[#allocation5] ss:$8 sps:$4 sm:$0xff]   ;;  %v1043_v21 = vld [vmem:[#allocation5 + $0x14] ss:$8 sps:$4 sm:$0xff]  }
  0x3e   :  { %119 = vperm.xlu0 %989, %v81_v1   ;;  %161 = vperm.xlu1 %991, %v82_v2   ;;  %v1015_v22 = vld [vmem:[#allocation2 + $0x70] ss:$8 sps:$4 sm:$0xff]   ;;  %v1046_v24 = vld [vmem:[#allocation5 + $0x24] ss:$8 sps:$4 sm:$0xff]   ;;  %v1018_v26 = vld [vmem:[#allocation2 + $0x80] ss:$8 sps:$4 sm:$0xff]  }
  0x3f   :  { %390 = vmatpush1.bf16.msra.mxu0 %v997_v6  ;;  %636 = vmatprep.subr.bf16.mxu1 %v1040_v19  ;;  %v1045_v23 = vld [vmem:[#allocation5 + $0x10] ss:$8 sps:$4 sm:$0xff]   ;;  %v1016_v25 = vld [vmem:[#allocation2 + $0x84] ss:$8 sps:$4 sm:$0xff]   ;;  %v1048_v27 = vld [vmem:[#allocation5 + $0x20] ss:$8 sps:$4 sm:$0xff]  }
  0x40   :  { %391 = vmatprep.subr.bf16.mxu0 %v998_v8  ;;  %637 = vmatpush1.bf16.msra.mxu1 %v1042_v20  ;;  %v1049_v28 = vld [vmem:[#allocation5 + $0x34] ss:$8 sps:$4 sm:$0xff]   ;;  %v1021_v30 = vld [vmem:[#allocation2 + $0x90] ss:$8 sps:$4 sm:$0xff]   ;;  %v1052_v32 = vld [vmem:[#allocation5 + $0x44] ss:$8 sps:$4 sm:$0xff]  }
  0x41   :  { %638 = vmatprep.subr.bf16.mxu1 %v1043_v21  ;;  %v1019_v29 = vld [vmem:[#allocation2 + $0x94] ss:$8 sps:$4 sm:$0xff]   ;;  %v1051_v31 = vld [vmem:[#allocation5 + $0x30] ss:$8 sps:$4 sm:$0xff]   ;;  %v1022_v33 = vld [vmem:[#allocation2 + $0xa4] ss:$8 sps:$4 sm:$0xff]  }
  0x42   :  { %v1024_v34 = vld [vmem:[#allocation2 + $0xa0] ss:$8 sps:$4 sm:$0xff]   ;;  %v1055_v36 = vld [vmem:[#allocation5 + $0x54] ss:$8 sps:$4 sm:$0xff]   ;;  %v1027_v38 = vld [vmem:[#allocation2 + $0xb0] ss:$8 sps:$4 sm:$0xff]  }
  0x43   :  { %392 = vmatpush1.bf16.msra.mxu0 %v1000_v9  ;;  %v1054_v35 = vld [vmem:[#allocation5 + $0x40] ss:$8 sps:$4 sm:$0xff]   ;;  %v1025_v37 = vld [vmem:[#allocation2 + $0xb4] ss:$8 sps:$4 sm:$0xff]   ;;  %v1057_v39 = vld [vmem:[#allocation5 + $0x50] ss:$8 sps:$4 sm:$0xff]  }
  0x44   :  { %393 = vmatprep.subr.bf16.mxu0 %v1001_v10  ;;  %639 = vmatpush1.bf16.msra.mxu1 %v1045_v23  ;;  %v1058_v40 = vld [vmem:[#allocation5 + $0x64] ss:$8 sps:$4 sm:$0xff]   ;;  %v1060_v42 = vld [vmem:[#allocation5 + $0x60] ss:$8 sps:$4 sm:$0xff]   ;;  %v1061_v44 = vld [vmem:[#allocation5 + $0x74] ss:$8 sps:$4 sm:$0xff]  }
  0x45   :  { %640 = vmatprep.subr.bf16.mxu1 %v1046_v24  ;;  %v1028_v41 = vld [vmem:[#allocation2 + $0xc4] ss:$8 sps:$4 sm:$0xff]   ;;  %v1030_v43 = vld [vmem:[#allocation2 + $0xc0] ss:$8 sps:$4 sm:$0xff]   ;;  %v1031_v45 = vld [vmem:[#allocation2 + $0xd4] ss:$8 sps:$4 sm:$0xff]  }
  0x46   :  { %v1063_v46 = vld [vmem:[#allocation5 + $0x70] ss:$8 sps:$4 sm:$0xff]   ;;  %v1064_v48 = vld [vmem:[#allocation5 + $0x84] ss:$8 sps:$4 sm:$0xff]   ;;  %v1066_v50 = vld [vmem:[#allocation5 + $0x80] ss:$8 sps:$4 sm:$0xff]  }
  0x47   :  { %394 = vmatpush1.bf16.msra.mxu0 %v1003_v11  ;;  %v1033_v47 = vld [vmem:[#allocation2 + $0xd0] ss:$8 sps:$4 sm:$0xff]   ;;  %v1034_v49 = vld [vmem:[#allocation2 + $0xe4] ss:$8 sps:$4 sm:$0xff]   ;;  %v1036_v51 = vld [vmem:[#allocation2 + $0xe0] ss:$8 sps:$4 sm:$0xff]  }
  0x48   :  { %395 = vmatprep.subr.bf16.mxu0 %v1004_v12  ;;  %641 = vmatpush1.bf16.msra.mxu1 %v1048_v27  ;;  %v1067_v52 = vld [vmem:[#allocation5 + $0x94] ss:$8 sps:$4 sm:$0xff]   ;;  %v1069_v54 = vld [vmem:[#allocation5 + $0x90] ss:$8 sps:$4 sm:$0xff]   ;;  %v1070_v56 = vld [vmem:[#allocation5 + $0xa4] ss:$8 sps:$4 sm:$0xff]  }
  0x49   :  { %642 = vmatprep.subr.bf16.mxu1 %v1049_v28  ;;  %v1037_v53 = vld [vmem:[#allocation2 + $0xf4] ss:$8 sps:$4 sm:$0xff]   ;;  %v1039_v55 = vld [vmem:[#allocation2 + $0xf0] ss:$8 sps:$4 sm:$0xff]   ;;  %v1072_v57 = vld [vmem:[#allocation5 + $0xa0] ss:$8 sps:$4 sm:$0xff]  }
  0x4a   :  { %v1073_v58 = vld [vmem:[#allocation5 + $0xb4] ss:$8 sps:$4 sm:$0xff]   ;;  %v1075_v59 = vld [vmem:[#allocation5 + $0xb0] ss:$8 sps:$4 sm:$0xff]   ;;  %v1076_v60 = vld [vmem:[#allocation5 + $0xc4] ss:$8 sps:$4 sm:$0xff]  }
  0x4b   :  { %396 = vmatpush1.bf16.msra.mxu0 %v1006_v13  ;;  %v1078_v61 = vld [vmem:[#allocation5 + $0xc0] ss:$8 sps:$4 sm:$0xff]   ;;  %v1079_v62 = vld [vmem:[#allocation5 + $0xd4] ss:$8 sps:$4 sm:$0xff]   ;;  %v1081_v63 = vld [vmem:[#allocation5 + $0xd0] ss:$8 sps:$4 sm:$0xff]  }
  0x4c   :  { %397 = vmatprep.subr.bf16.mxu0 %v1007_v14  ;;  %643 = vmatpush1.bf16.msra.mxu1 %v1051_v31  ;;  %v92_v1 = vshrl.u32 %v91_v0, 7  ;;  %v84_v4 = vld [vmem:[%s1373_s2] ss:$2 sm:$0x3] }
  0x4d   :  { %644 = vmatprep.subr.bf16.mxu1 %v1052_v32  ;;  %v83_v5 = vld [vmem:[%s1375_s4] sm:$0x3] }
  0x4e   :  { %v1317_v2 = vsub.s32 0, %v92_v1  ;;  %v1319_v3 = vsub.s32 1, %v92_v1  ;;  %v873_v8 = vld [vmem:[%s1373_s2 + $0x1] ss:$2 sm:$0x3] }
  0x4f   :  { %398 = vmatpush1.bf16.msra.mxu0 %v1009_v15  ;;  %v137_v10 = vld [vmem:[%s1374_s3] ss:$2 sm:$0x3]  ;;  %v874_v14 = vld [vmem:[%s1374_s3 + $0x1] ss:$2 sm:$0x3] }
  0x50   :  { %399 = vmatprep.subr.bf16.mxu0 %v1010_v16  ;;  %645 = vmatpush1.bf16.msra.mxu1 %v1054_v35  ;;  %v94_v6 = vrot.slane %v84_v4, %v1317_v2  ;;  %v98_v7 = vrot.slane %v84_v4, %v1319_v3  ;;  %v107_v12 = vrot.slane %v83_v5, %v1317_v2 }
  0x51   :  { %646 = vmatprep.subr.bf16.mxu1 %v1055_v36  ;;  %v111_v13 = vrot.slane %v83_v5, %v1319_v3  ;;  %v147_v19 = vrot.slane %v137_v10, %v1317_v2  ;;  %v151_v20 = vrot.slane %v137_v10, %v1319_v3  ;;  %v168_v21 = vrot.slane %v874_v14, %v1317_v2  ;;  %v1100_v10 = vld [vmem:[#allocation7 + $0x70] sm:$0xff]  }
  0x53   :  { %400 = vmatpush1.bf16.msra.mxu0 %v1012_v17  ;;  %v126_v17 = vrot.slane %v873_v8, %v1317_v2 }
  0x54   :  { %401 = vmatprep.subr.bf16.mxu0 %v1013_v18  ;;  %647 = vmatpush1.bf16.msra.mxu1 %v1057_v39  ;;  %v130_v18 = vrot.slane %v873_v8, %v1319_v3 }
  0x55   :  { %648 = vmatprep.subr.bf16.mxu1 %v1058_v40 }
  0x57   :  { %402 = vmatpush1.bf16.msra.mxu0 %v1015_v22  ;;  %v172_v22 = vrot.slane %v874_v14, %v1319_v3  ;;  %v464_v14 = vld [vmem:[%s1379_s8] sm:$0x3]  ;;  %s1207_s8 = smov [#allocation8]  }
  0x58   :  { %403 = vmatprep.subr.bf16.mxu0 %v1016_v25  ;;  %649 = vmatpush1.bf16.msra.mxu1 %v1060_v42  ;;  %s863_s13 = sshll.u32 %s1207_s8, 4  ;;  %s864_s13 = int_to_ptr.vmem [resolvable:$true] %s863_s13 }
  0x59   :  { %650 = vmatprep.subr.bf16.mxu1 %v1061_v44  ;;  %v1084_v44 = vld [vmem:[#allocation5 + $0xe0] ss:$8 sps:$4 sm:$0xff]   ;;  %s1170_s14 = scalar_lea.vmem %s864_s13, 128  ;;  %p1175_p11 = scmp.lt.s32.totalorder %s864_s13, %s864_s13 }
  0x5a   :  { %p1171_p10 = scmp.ne.s32.totalorder %s864_s13, %s1170_s14  ;;  %p1176_p12 = scmp.lt.s32.totalorder %s1170_s14, %s1170_s14 }
  0x5b   :  { %404 = vmatpush1.bf16.msra.mxu0 %v1018_v26 }
  0x5c   :  { %405 = vmatprep.subr.bf16.mxu0 %v1019_v29  ;;  %651 = vmatpush1.bf16.msra.mxu1 %v1063_v46  ;;  %v1087_v46 = vld [vmem:[#allocation5 + $0xf0] ss:$8 sps:$4 sm:$0xff]   ;;  %p1177_p13 = por %p1176_p12, %p1175_p11 }
  0x5d   :  { %652 = vmatprep.subr.bf16.mxu1 %v1064_v48  ;;  %v1089_v48 = vld [vmem:[#allocation7] sm:$0xff]  }
  0x5e   :  { %p1178_p0 = pnand %p1177_p13, %p1171_p10 }
  0x5f   :  { %406 = vmatpush1.bf16.msra.mxu0 %v1021_v30 }
  0x60   :  { %407 = vmatprep.subr.bf16.mxu0 %v1022_v33  ;;  %653 = vmatpush1.bf16.msra.mxu1 %v1066_v50  ;;  %v1091_v50 = vld [vmem:[#allocation7 + $0x8] sm:$0xff]  }
  0x61   :  { %654 = vmatprep.subr.bf16.mxu1 %v1067_v52  ;;  %v1093_v52 = vld [vmem:[#allocation7 + $0x10] sm:$0xff]  }
  0x63   :  { %408 = vmatpush1.bf16.msra.mxu0 %v1024_v34 }
  0x64   :  { %409 = vmatprep.subr.bf16.mxu0 %v1025_v37  ;;  %655 = vmatpush1.bf16.msra.mxu1 %v1069_v54  ;;  %v1095_v54 = vld [vmem:[#allocation7 + $0x18] sm:$0xff]  }
  0x65   :  { %656 = vmatprep.subr.bf16.mxu1 %v1070_v56  ;;  %v1097_v56 = vld [vmem:[#allocation7 + $0x20] sm:$0xff]  }
  0x67   :  { %410 = vmatpush1.bf16.msra.mxu0 %v1027_v38 }
  0x68   :  { %411 = vmatprep.subr.bf16.mxu0 %v1028_v41  ;;  %657 = vmatpush1.bf16.msra.mxu1 %v1072_v57  ;;  %v1098_v57 = vld [vmem:[#allocation7 + $0x68] sm:$0xff]  }
  0x69   :  { %658 = vmatprep.subr.bf16.mxu1 %v1073_v58  ;;  %v1099_v58 = vld [vmem:[#allocation7 + $0x28] sm:$0xff]  }
  0x6b   :  { %412 = vmatpush1.bf16.msra.mxu0 %v1030_v43  ;;  %v1082_v43 = vld [vmem:[#allocation5 + $0xe4] ss:$8 sps:$4 sm:$0xff]  }
  0x6c   :  { %413 = vmatprep.subr.bf16.mxu0 %v1031_v45  ;;  %659 = vmatpush1.bf16.msra.mxu1 %v1075_v59  ;;  %v1085_v45 = vld [vmem:[#allocation5 + $0xf4] ss:$8 sps:$4 sm:$0xff]   ;;  %v215_v59 = vld [vmem:[%s1377_s6] sm:$0x3] }
  0x6d   :  { %660 = vmatprep.subr.bf16.mxu1 %v1076_v60  ;;  %v220_v60 = vrot.slane %v215_v59, %v1317_v2 }
  0x6f   :  { %414 = vmatpush1.bf16.msra.mxu0 %v1033_v47  ;;  %v1088_v47 = vld [vmem:[#allocation7 + $0x40] sm:$0xff]  }
  0x70   :  { %415 = vmatprep.subr.bf16.mxu0 %v1034_v49  ;;  %661 = vmatpush1.bf16.msra.mxu1 %v1078_v61  ;;  %v1090_v49 = vld [vmem:[#allocation7 + $0x48] sm:$0xff]   ;;  %v224_v61 = vrot.slane %v215_v59, %v1319_v3 }
  0x71   :  { %662 = vmatprep.subr.bf16.mxu1 %v1079_v62 }
  0x73   :  { %416 = vmatpush1.bf16.msra.mxu0 %v1036_v51  ;;  %v1092_v51 = vld [vmem:[#allocation7 + $0x50] sm:$0xff]  }
  0x74   :  { %417 = vmatprep.subr.bf16.mxu0 %v1037_v53  ;;  %663 = vmatpush1.bf16.msra.mxu1 %v1081_v63  ;;  %v1094_v53 = vld [vmem:[#allocation7 + $0x58] sm:$0xff]  }
  0x75   :  { %664 = vmatprep.subr.bf16.mxu1 %v1082_v43 }
  0x77   :  { %418 = vmatpush1.bf16.msra.mxu0 %v1039_v55  ;;  %v1096_v55 = vld [vmem:[#allocation7 + $0x60] sm:$0xff]  }
  0x78   :  { %665 = vmatpush1.bf16.msra.mxu1 %v1084_v44  ;;  %956 = vmatprep.subr.bf16.mxu0 %v1088_v47 }
  0x79   :  { %666 = vmatprep.subr.bf16.mxu1 %v1085_v45 }
  0x7c   :  { %667 = vmatpush1.bf16.msra.mxu1 %v1087_v46 }
  0xb8   :  { %v88_v9 = vpop.permute.xlu0 %87  ;;  %v141_v11 = vpop.permute.xlu1 %140 }
  0xb9   :  { %v101_v15 = vmul.f32 %v94_v6, %v88_v9  ;;  %v102_v16 = vmul.f32 %v98_v7, %v88_v9  ;;  %v154_v29 = vmul.f32 %v147_v19, %v141_v11  ;;  %v155_v30 = vmul.f32 %v151_v20, %v141_v11  ;;  %v1101_v11 = vld [vmem:[#allocation7 + $0x30] sm:$0xff]  }
  0xbb   :  { %v114_v25 = vadd.f32 %v107_v12, %v101_v15  ;;  %v115_v26 = vadd.f32 %v111_v13, %v102_v16  ;;  %v1102_v12 = vld [vmem:[#allocation7 + $0x78] sm:$0xff]   ;;  %v469_v15 = vrot.slane %v464_v14, %v1317_v2  ;;  %v473_v16 = vrot.slane %v464_v14, %v1319_v3 }
  0xbc   :  { %v1103_v13 = vld [vmem:[#allocation7 + $0x38] sm:$0xff]  }
  0xbd   :  { %v120_v23 = vpop.permute.xlu0 %119  ;;  %v162_v24 = vpop.permute.xlu1 %161 }
  0xbe   :  { %v133_v27 = vmul.f32 %v126_v17, %v120_v23  ;;  %v134_v28 = vmul.f32 %v130_v18, %v120_v23  ;;  %v175_v33 = vmul.f32 %v168_v21, %v162_v24  ;;  %v176_v34 = vmul.f32 %v172_v22, %v162_v24 }
  0xc0   :  { %v135_v31 = vadd.f32 %v133_v27, %v114_v25  ;;  %v136_v32 = vadd.f32 %v134_v28, %v115_v26  ;;  %v939_v28 = vld [vmem:[%s1381_s10] ss:$0 sm:$0xff] }
  0xc2   :  { %v156_v35 = vadd.f32 %v154_v29, %v135_v31  ;;  %v157_v36 = vadd.f32 %v155_v30, %v136_v32 }
  0xc4   :  { %v177_v37 = vadd.f32 %v175_v33, %v156_v35  ;;  %v178_v38 = vadd.f32 %v176_v34, %v157_v36 }
  0xc6   :  { %v179_v39 = vmax.f32 %v177_v37, 0.0  ;;  %v180_v40 = vmax.f32 %v178_v38, 0.0 }
  0xc8   :  { %v181_v41 = vpack.c.bf16 %v179_v39, %v179_v39  ;;  %v182_v42 = vpack.c.bf16 %v180_v40, %v180_v40 }
  0xca   :  { %419 = vmatprep.mubr.bf16.mxu0 %v182_v42 }
  0xcb   :  { %420 = vmatmul.mubr.bf16.vlgmr.msra.gmra.mrb[0].mxu0 %v181_v41 }
  0xcc   :  { %957 = vmatpush3.bf16.msra.mxu0 %v1089_v48 }
  0xcd   :  { %958 = vmatprep.subr.bf16.mxu0 %v1090_v49 }
  0xd0   :  { %959 = vmatpush3.bf16.msra.mxu0 %v1091_v50 }
  0xd1   :  { %960 = vmatprep.subr.bf16.mxu0 %v1092_v51 }
  0xd4   :  { %961 = vmatpush3.bf16.msra.mxu0 %v1093_v52 }
  0xd5   :  { %962 = vmatprep.subr.bf16.mxu0 %v1094_v53 }
  0xd8   :  { %963 = vmatpush3.bf16.msra.mxu0 %v1095_v54 }
  0xd9   :  { %964 = vmatprep.subr.bf16.mxu0 %v1096_v55 }
  0xdc   :  { %965 = vmatpush3.bf16.msra.mxu0 %v1097_v56 }
  0xdd   :  { %966 = vmatprep.subr.bf16.mxu0 %v1098_v57 }
  0xe0   :  { %967 = vmatpush3.bf16.msra.mxu0 %v1099_v58 }
  0xe1   :  { %968 = vmatprep.subr.bf16.mxu0 %v1100_v10 }
  0xe4   :  { %969 = vmatpush3.bf16.msra.mxu0 %v1101_v11 }
  0xe5   :  { %970 = vmatprep.subr.bf16.mxu0 %v1102_v12 }
  0xe8   :  { %971 = vmatpush3.bf16.msra.mxu0 %v1103_v13 }
 0x19e   :  { %v421_v62 = vpop.f32.mrb[0].mxu0 }
 0x19f   :  { %v422_v63 = vadd.f32 %v421_v62, %v220_v60  ;;  %v423_v0 = vpop.f32.mrb[1].mxu0 }
 0x1a0   :  { %v424_v1 = vadd.f32 %v423_v0, %v224_v61  ;;  %v425_v4 = vpop.f32.mrb[2].mxu0 }
 0x1a1   :  { %v428_v5 = vmax.f32 %v422_v63, 0.0  ;;  %v426_v6 = vpop.f32.mrb[3].mxu0 }
 0x1a2   :  { %v429_v7 = vmax.f32 %v424_v1, 0.0 }
 0x1a3   :  { %v430_v9 = vpack.c.bf16 %v428_v5, %v428_v5 }
 0x1a4   :  { %v431_v8 = vpack.c.bf16 %v429_v7, %v429_v7 }
 0x1a6   :  { %668 = vmatprep.mubr.bf16.mxu1 %v431_v8 }
 0x1a7   :  { %669 = vmatmul.mubr.bf16.vlgmr.msra.gmra.mrb[0].mxu1 %v430_v9 }
 0x27a   :  { %v670_v17 = vpop.f32.mrb[0].mxu1 }
 0x27b   :  { %v671_v18 = vadd.f32 %v670_v17, %v469_v15  ;;  %v672_v19 = vpop.f32.mrb[1].mxu1 }
 0x27c   :  { %v673_v20 = vadd.f32 %v672_v19, %v473_v16  ;;  %v674_v21 = vpop.f32.mrb[2].mxu1 }
 0x27d   :  { %v677_v22 = vmax.f32 %v671_v18, 0.0  ;;  %v675_v23 = vpop.f32.mrb[3].mxu1 }
 0x27e   :  { %v678_v24 = vmax.f32 %v673_v20, 0.0 }
 0x27f   :  { %v679_v26 = vpack.c.bf16 %v677_v22, %v677_v22 }
 0x280   :  { %v680_v25 = vpack.c.bf16 %v678_v24, %v678_v24 }
 0x282   :  { %848 = vmatprep.mubr.bf16.mxu0 %v680_v25 }
 0x283   :  { %849 = vmatmul.mubr.bf16.vlgmr.msra.gmra.mrb[4].mxu0 %v679_v26 }
 0x356   :  { %v972_v27 = vpop.f32.mrb[4].mxu0 }
 0x357   :  { %v973_v2 = vpop.f32.mrb[5].mxu0 }
 0x358   :  { %v974_v3 = vadd.f32 %v973_v2, %v972_v27  ;;  %v975_v29 = vpop.f32.mrb[6].mxu0 }
 0x359   :  { %v976_v30 = vpop.f32.mrb[7].mxu0 }
 0x35a   :  { %v851_v31 = vadd.f32 %v974_v3, %v939_v28 }
 0x35c   :  { %856 = vst [vmem:[#allocation8] sm:$0xff] %v851_v31 }
 0x35d   :  { %1181 = shalt.err (!%p1178_p0)
}
 0x35e   :  { %s1182_s10 = scalar_lea.hbm %s1382_s11, 128 }
 0x35f   :  { %p1183_p1 = scmp.ne.s32.totalorder %s1382_s11, %s1182_s10  ;;  %p1186_p2 = scmp.lt.u32.totalorder %s1182_s10, %s1382_s11 }
 0x361   :  { %p1188_p3 = pnand %p1186_p2, %p1183_p1 }
 0x363   :  { %1191 = shalt.err (!%p1188_p3)
}
 0x364   :  { %866 = dma.vmem_to_hbm [thread:$0]  %s864_s13, 128, %s1382_s11, [#allocation4]  }
 0x365   :  { %1196 = dma.done.wait [#allocation4], 128  }
 0x366   :  { %1197 = vsyncadd [#allocation4], 4294967168 }
 0x367   :  { %870 = vsyncpa [#allocation3], 1 }
 0x368   :  { %871 = vsyncpa [#allocation6], 1 }
 0x369   :  { %872 = vsyncpa [#allocation4], 1 }

</bundles_post_ra>
